<compile_context>
chip_gen: v6e
topology: v6e:2x2x1
jax: 0.10.0
libtpu: 0.0.40
codegen_flags: <defaults>
</compile_context>

<pallas_src>
import jax
import jax.numpy as jnp
from jax.experimental import pallas as pl
from jax.experimental.pallas import tpu as pltpu


# ------------------------------ Pallas kernels ------------------------------ #

def _conv_mm_kernel(p_ref, w_ref, b_ref, o_ref):
    """Per-image conv-as-matmul, transposed so spatial is lane-dense.

    p_ref: (1, K, Mp)    bf16 im2col patches^T (K = Cin*kh*kw, Mp = Ho*Wo padded to 128)
    w_ref: (Cout, K)     bf16 PyTorch weight.reshape(Cout, Cin*kh*kw)
    b_ref: (Cout, 1)     f32
    o_ref: (1, Cout, Mp) f32 = relu(W @ P^T + b)   (already NCHW order)
    """
    y = jnp.dot(w_ref[...], p_ref[0], preferred_element_type=jnp.float32)
    o_ref[0] = jnp.maximum(y + b_ref[...], 0.0).astype(o_ref.dtype)


def _fc_head_kernel(x_ref, w1_ref, b1_ref, w2_ref, b2_ref, o_ref, acc_ref):
    """Fused fc1 (+ReLU) and fc2, with the fc1 contraction tiled over the grid.

    x_ref : (B, tk)  bf16 block of the flattened conv features
    w1_ref: (tk, H)  bf16 block of fc1 weight (pre-transposed)
    acc_ref: (B, H)  f32 accumulator scratch (persists across grid steps)
    """
    k = pl.program_id(0)

    @pl.when(k == 0)
    def _():
        acc_ref[...] = jnp.zeros_like(acc_ref)

    acc_ref[...] += jnp.dot(x_ref[...], w1_ref[...],
                            preferred_element_type=jnp.float32)

    @pl.when(k == pl.num_programs(0) - 1)
    def _():
        h = jnp.maximum(acc_ref[...] + b1_ref[...], 0.0)
        o = jnp.dot(h.astype(w2_ref.dtype), w2_ref[...],
                    preferred_element_type=jnp.float32) + b2_ref[...]
        o_ref[...] = o.astype(o_ref.dtype)


# ------------------------------ Kernel wrappers ------------------------------ #

def conv_matmul_relu(patches_t, w_mat, b_col):
    """relu(W @ P^T + b) per image. patches_t:(B,K,Mp) bf16, w_mat:(Cout,K) bf16."""
    B, K, Mp = patches_t.shape
    Cout = w_mat.shape[0]
    flops = 2 * B * Cout * K * Mp
    bytes_accessed = (B * K * Mp + Cout * K) * 2 + (Cout + B * Cout * Mp) * 4
    return pl.pallas_call(
        _conv_mm_kernel,
        out_shape=jax.ShapeDtypeStruct((B, Cout, Mp), jnp.float32),
        grid=(B,),
        in_specs=[
            pl.BlockSpec((1, K, Mp), lambda b: (b, 0, 0)),
            pl.BlockSpec((Cout, K), lambda b: (0, 0)),
            pl.BlockSpec((Cout, 1), lambda b: (0, 0)),
        ],
        out_specs=pl.BlockSpec((1, Cout, Mp), lambda b: (b, 0, 0)),
        compiler_params=pltpu.CompilerParams(
            dimension_semantics=("parallel",)),
        cost_estimate=pl.CostEstimate(
            flops=flops, transcendentals=0, bytes_accessed=bytes_accessed),
    )(patches_t, w_mat, b_col)


def fc_head(x, wf1t, bf1, wf2t, bf2, *, tk=3456):
    """out = relu(x @ wf1t + bf1) @ wf2t + bf2, K-tiled so wf1t streaming overlaps MXU."""
    B, K = x.shape
    H = wf1t.shape[1]
    A = wf2t.shape[1]
    if K % tk != 0:               # fall back to a single block if K isn't divisible
        tk = K
    nk = K // tk
    flops = 2 * B * (K * H + H * A)
    bytes_accessed = (B * K + K * H + H * A) * 2 + (H + A + B * A) * 4
    return pl.pallas_call(
        _fc_head_kernel,
        out_shape=jax.ShapeDtypeStruct((B, A), jnp.float32),
        grid=(nk,),
        in_specs=[
            pl.BlockSpec((B, tk), lambda k: (0, k)),
            pl.BlockSpec((tk, H), lambda k: (k, 0)),
            pl.BlockSpec((1, H), lambda k: (0, 0)),
            pl.BlockSpec((H, A), lambda k: (0, 0)),
            pl.BlockSpec((1, A), lambda k: (0, 0)),
        ],
        out_specs=pl.BlockSpec((B, A), lambda k: (0, 0)),
        scratch_shapes=[pltpu.VMEM((B, H), jnp.float32)],
        compiler_params=pltpu.CompilerParams(
            dimension_semantics=("arbitrary",)),
        cost_estimate=pl.CostEstimate(
            flops=flops, transcendentals=0, bytes_accessed=bytes_accessed),
    )(x, wf1t, bf1, wf2t, bf2)


# --------------------------------- JAX glue --------------------------------- #

def _im2col_t(x, kh, kw, stride, lane_align=128):
    """x:(B,C,H,W) -> bf16 patches^T:(B, C*kh*kw, Mpad) with Mpad = roundup(Ho*Wo, 128).

    K ordering is (C major, kh, kw minor), matching weight.reshape(Cout, -1);
    M ordering is (Ho major, Wo minor), i.e. the NCHW spatial flatten.  Built
    directly in the transposed layout, zero-padded on the lane axis so the
    Pallas kernel gets lane-dense (128-multiple) loads and stores.
    """
    B, C, H, W = x.shape
    Ho = (H - kh) // stride + 1
    Wo = (W - kw) // stride + 1
    xb = x.astype(jnp.bfloat16)
    cols = []
    for i in range(kh):
        for j in range(kw):
            cols.append(xb[:, :, i:i + stride * Ho:stride, j:j + stride * Wo:stride])
    p = jnp.stack(cols, axis=2)                      # (B, C, kh*kw, Ho, Wo)
    p = p.reshape(B, C * kh * kw, Ho * Wo)
    m = Ho * Wo
    m_pad = ((m + lane_align - 1) // lane_align) * lane_align
    if m_pad > m:
        p = jnp.pad(p, ((0, 0), (0, 0), (0, m_pad - m)))
    return p, Ho, Wo


# ------------------------------ Parameter init ------------------------------ #

def _xavier_uniform(key, shape, fan_in, fan_out):
    limit = jnp.sqrt(6.0 / (fan_in + fan_out))
    return jax.random.uniform(key, shape, jnp.float32, -limit, limit)


def init_dqn_params(key, action_space, hidden=64, reshaped_size=10368):
    keys = jax.random.split(key, 8)
    # conv1: Conv2d(3, 16, 8, stride=2) -- stored pre-reshaped as bf16 (16, 192)
    w1 = _xavier_uniform(keys[0], (16, 3, 8, 8), 3 * 8 * 8, 16 * 8 * 8)
    b1 = jax.random.uniform(keys[1], (16,), jnp.float32,
                            -1.0 / jnp.sqrt(3 * 8 * 8), 1.0 / jnp.sqrt(3 * 8 * 8))
    # conv2: Conv2d(16, 32, 3, stride=2) -- stored pre-reshaped as bf16 (32, 144)
    w2 = _xavier_uniform(keys[2], (32, 16, 3, 3), 16 * 3 * 3, 32 * 3 * 3)
    b2 = jax.random.uniform(keys[3], (32,), jnp.float32,
                            -1.0 / jnp.sqrt(16 * 3 * 3), 1.0 / jnp.sqrt(16 * 3 * 3))
    # fc1 / fc2 -- stored pre-transposed as bf16 (K, N) so there is no .T per forward.
    wf1t = _xavier_uniform(keys[4], (reshaped_size, hidden), reshaped_size, hidden)
    bf1 = jax.random.uniform(keys[5], (hidden,), jnp.float32,
                             -1.0 / jnp.sqrt(float(reshaped_size)),
                             1.0 / jnp.sqrt(float(reshaped_size)))
    wf2t = _xavier_uniform(keys[6], (hidden, action_space), hidden, action_space)
    bf2 = jax.random.uniform(keys[7], (action_space,), jnp.float32,
                             -1.0 / jnp.sqrt(float(hidden)), 1.0 / jnp.sqrt(float(hidden)))
    return dict(
        w1m=w1.reshape(16, 3 * 8 * 8).astype(jnp.bfloat16), b1=b1.reshape(16, 1),
        w2m=w2.reshape(32, 16 * 3 * 3).astype(jnp.bfloat16), b2=b2.reshape(32, 1),
        wf1t=wf1t.astype(jnp.bfloat16), bf1=bf1.reshape(1, hidden),
        wf2t=wf2t.astype(jnp.bfloat16), bf2=bf2.reshape(1, action_space),
    )


# ---------------------------------- Forward --------------------------------- #

def dqn_forward(params, x, reshaped_size=10368):
    """x: (B, 3, 80, 80) NCHW float32 -> (B, action_space) Q-values."""
    B = x.shape[0]
    # conv1 + ReLU (kernel output is NCHW-ordered, lane-padded 1369 -> 1408)
    p1, ho1, wo1 = _im2col_t(x, 8, 8, 2)                        # (B, 192, 1408) bf16
    y1p = conv_matmul_relu(p1, params["w1m"], params["b1"])     # (B, 16, 1408) f32
    # padding columns are relu(bias) != 0 -> slice them off before conv2's im2col
    y1 = y1p[:, :, :ho1 * wo1].reshape(B, 16, ho1, wo1)         # (B, 16, 37, 37)
    # conv2 + ReLU (lane-padded 324 -> 384)
    p2, ho2, wo2 = _im2col_t(y1, 3, 3, 2)                       # (B, 144, 384) bf16
    y2p = conv_matmul_relu(p2, params["w2m"], params["b2"])     # (B, 32, 384) f32
    # drop padding, NCHW flatten (contiguous), then fused K-tiled fc1 + ReLU + fc2.
    xf = y2p[:, :, :ho2 * wo2].reshape(B, reshaped_size)        # (B, 10368)
    xf = xf.astype(jnp.bfloat16)
    return fc_head(xf, params["wf1t"], params["bf1"],
                   params["wf2t"], params["bf2"])               # (B, action_space)


# ----------------------------------- Main ------------------------------------ #

if __name__ == "__main__":
    action_space = 6
    hidden = 64
    batch = 2

    key = jax.random.PRNGKey(0)
    k_params, k_x = jax.random.split(key)
    params = init_dqn_params(k_params, action_space, hidden)
    # reshaped_size = 10368 = 32*18*18  =>  80x80 RGB input frames.
    x = jax.random.normal(k_x, (batch, 3, 80, 80), jnp.float32)

    q = jax.jit(dqn_forward)(params, x)
    q = jax.block_until_ready(q)

    assert q.shape == (batch, action_space), q.shape
    assert bool(jnp.all(jnp.isfinite(q)))
    print("KERNEL_OK")
</pallas_src>

<mosaic_0001>
module attributes {stable_mosaic.version = 11 : i64} {
  func.func @_conv_mm_kernel(%arg0: i32, %arg1: memref<1x192x1408xbf16, #tpu.memory_space<vmem>>, %arg2: memref<16x192xbf16, #tpu.memory_space<vmem>>, %arg3: memref<16x1xf32, #tpu.memory_space<vmem>>, %arg4: memref<1x16x1408xf32, #tpu.memory_space<vmem>>) attributes {dimension_semantics = [#tpu.dimension_semantics<parallel>], iteration_bounds = array<i64: 2>, scalar_prefetch = 0 : i64, scratch_operands = 0 : i64, tpu.core_type = #tpu.core_type<tc>, window_params = [{transform_indices = @transform_0, window_bounds = array<i64: 1, 192, 1408>}, {pipeline_mode = #tpu.pipeline_mode<synchronous>, transform_indices = @transform_1, window_bounds = array<i64: 16, 192>}, {pipeline_mode = #tpu.pipeline_mode<synchronous>, transform_indices = @transform_2, window_bounds = array<i64: 16, 1>}, {transform_indices = @transform_3, window_bounds = array<i64: 1, 16, 1408>}]} {
    %c0 = arith.constant 0 : index
    %c0_0 = arith.constant 0 : index
    %0 = vector.load %arg2[%c0, %c0_0] : memref<16x192xbf16, #tpu.memory_space<vmem>>, vector<16x192xbf16>
    %c0_1 = arith.constant 0 : index
    %c0_2 = arith.constant 0 : index
    %c0_3 = arith.constant 0 : index
    %1 = vector.load %arg1[%c0_1, %c0_2, %c0_3] : memref<1x192x1408xbf16, #tpu.memory_space<vmem>>, vector<1x192x1408xbf16>
    %2 = vector.shape_cast %1 : vector<1x192x1408xbf16> to vector<192x1408xbf16>
    %cst = arith.constant dense<0.000000e+00> : vector<16x1408xf32>
    %3 = tpu.matmul %0, %2, %cst {dimension_numbers = #tpu.dot_dimension_numbers<[1], [0], [0], [1], [0, 0, 1, 1], [], []>} : vector<16x192xbf16>, vector<192x1408xbf16>, vector<16x1408xf32> -> vector<16x1408xf32>
    %c0_4 = arith.constant 0 : index
    %c0_5 = arith.constant 0 : index
    %4 = vector.load %arg3[%c0_4, %c0_5] : memref<16x1xf32, #tpu.memory_space<vmem>>, vector<16x1xf32>
    %5 = vector.broadcast %4 : vector<16x1xf32> to vector<16x1408xf32>
    %6 = arith.addf %3, %5 : vector<16x1408xf32>
    %cst_6 = arith.constant 0.000000e+00 : f32
    %7 = vector.broadcast %cst_6 : f32 to vector<16x1408xf32>
    %8 = arith.maximumf %6, %7 : vector<16x1408xf32>
    %c0_7 = arith.constant 0 : index
    %c0_8 = arith.constant 0 : index
    %c0_9 = arith.constant 0 : index
    %9 = vector.load %arg4[%c0_7, %c0_8, %c0_9] : memref<1x16x1408xf32, #tpu.memory_space<vmem>>, vector<1x16x1408xf32>
    %10 = vector.shape_cast %9 : vector<1x16x1408xf32> to vector<16x1408xf32>
    %11 = vector.shape_cast %8 : vector<16x1408xf32> to vector<1x16x1408xf32>
    tpu.vector_store %arg4[%c0_7, %c0_8, %c0_9], %11 {strides = array<i32>} : memref<1x16x1408xf32, #tpu.memory_space<vmem>>, vector<1x16x1408xf32>,
    return
  }
  func.func @transform_0(%arg0: i32) -> (i32, i32, i32) {
    %c0_i32 = arith.constant 0 : i32
    %c0_i32_0 = arith.constant 0 : i32
    %c0_i32_1 = arith.constant 0 : i32
    return %arg0, %c0_i32, %c0_i32_0 : i32, i32, i32
  }
  func.func @transform_1(%arg0: i32) -> (i32, i32) {
    %c0_i32 = arith.constant 0 : i32
    %c0_i32_0 = arith.constant 0 : i32
    %c0_i32_1 = arith.constant 0 : i32
    return %c0_i32, %c0_i32_0 : i32, i32
  }
  func.func @transform_2(%arg0: i32) -> (i32, i32) {
    %c0_i32 = arith.constant 0 : i32
    %c0_i32_0 = arith.constant 0 : i32
    %c0_i32_1 = arith.constant 0 : i32
    return %c0_i32, %c0_i32_0 : i32, i32
  }
  func.func @transform_3(%arg0: i32) -> (i32, i32, i32) {
    %c0_i32 = arith.constant 0 : i32
    %c0_i32_0 = arith.constant 0 : i32
    %c0_i32_1 = arith.constant 0 : i32
    return %arg0, %c0_i32, %c0_i32_0 : i32, i32, i32
  }
}

module attributes {stable_mosaic.version = 11 : i64} {
  func.func @_conv_mm_kernel(%arg0: i32, %arg1: memref<1x144x384xbf16, #tpu.memory_space<vmem>>, %arg2: memref<32x144xbf16, #tpu.memory_space<vmem>>, %arg3: memref<32x1xf32, #tpu.memory_space<vmem>>, %arg4: memref<1x32x384xf32, #tpu.memory_space<vmem>>) attributes {dimension_semantics = [#tpu.dimension_semantics<parallel>], iteration_bounds = array<i64: 2>, scalar_prefetch = 0 : i64, scratch_operands = 0 : i64, tpu.core_type = #tpu.core_type<tc>, window_params = [{transform_indices = @transform_0, window_bounds = array<i64: 1, 144, 384>}, {pipeline_mode = #tpu.pipeline_mode<synchronous>, transform_indices = @transform_1, window_bounds = array<i64: 32, 144>}, {pipeline_mode = #tpu.pipeline_mode<synchronous>, transform_indices = @transform_2, window_bounds = array<i64: 32, 1>}, {transform_indices = @transform_3, window_bounds = array<i64: 1, 32, 384>}]} {
    %c0 = arith.constant 0 : index
    %c0_0 = arith.constant 0 : index
    %0 = vector.load %arg2[%c0, %c0_0] : memref<32x144xbf16, #tpu.memory_space<vmem>>, vector<32x144xbf16>
    %c0_1 = arith.constant 0 : index
    %c0_2 = arith.constant 0 : index
    %c0_3 = arith.constant 0 : index
    %1 = vector.load %arg1[%c0_1, %c0_2, %c0_3] : memref<1x144x384xbf16, #tpu.memory_space<vmem>>, vector<1x144x384xbf16>
    %2 = vector.shape_cast %1 : vector<1x144x384xbf16> to vector<144x384xbf16>
    %cst = arith.constant dense<0.000000e+00> : vector<32x384xf32>
    %3 = tpu.matmul %0, %2, %cst {dimension_numbers = #tpu.dot_dimension_numbers<[1], [0], [0], [1], [0, 0, 1, 1], [], []>} : vector<32x144xbf16>, vector<144x384xbf16>, vector<32x384xf32> -> vector<32x384xf32>
    %c0_4 = arith.constant 0 : index
    %c0_5 = arith.constant 0 : index
    %4 = vector.load %arg3[%c0_4, %c0_5] : memref<32x1xf32, #tpu.memory_space<vmem>>, vector<32x1xf32>
    %5 = vector.broadcast %4 : vector<32x1xf32> to vector<32x384xf32>
    %6 = arith.addf %3, %5 : vector<32x384xf32>
    %cst_6 = arith.constant 0.000000e+00 : f32
    %7 = vector.broadcast %cst_6 : f32 to vector<32x384xf32>
    %8 = arith.maximumf %6, %7 : vector<32x384xf32>
    %c0_7 = arith.constant 0 : index
    %c0_8 = arith.constant 0 : index
    %c0_9 = arith.constant 0 : index
    %9 = vector.load %arg4[%c0_7, %c0_8, %c0_9] : memref<1x32x384xf32, #tpu.memory_space<vmem>>, vector<1x32x384xf32>
    %10 = vector.shape_cast %9 : vector<1x32x384xf32> to vector<32x384xf32>
    %11 = vector.shape_cast %8 : vector<32x384xf32> to vector<1x32x384xf32>
    tpu.vector_store %arg4[%c0_7, %c0_8, %c0_9], %11 {strides = array<i32>} : memref<1x32x384xf32, #tpu.memory_space<vmem>>, vector<1x32x384xf32>,
    return
  }
  func.func @transform_0(%arg0: i32) -> (i32, i32, i32) {
    %c0_i32 = arith.constant 0 : i32
    %c0_i32_0 = arith.constant 0 : i32
    %c0_i32_1 = arith.constant 0 : i32
    return %arg0, %c0_i32, %c0_i32_0 : i32, i32, i32
  }
  func.func @transform_1(%arg0: i32) -> (i32, i32) {
    %c0_i32 = arith.constant 0 : i32
    %c0_i32_0 = arith.constant 0 : i32
    %c0_i32_1 = arith.constant 0 : i32
    return %c0_i32, %c0_i32_0 : i32, i32
  }
  func.func @transform_2(%arg0: i32) -> (i32, i32) {
    %c0_i32 = arith.constant 0 : i32
    %c0_i32_0 = arith.constant 0 : i32
    %c0_i32_1 = arith.constant 0 : i32
    return %c0_i32, %c0_i32_0 : i32, i32
  }
  func.func @transform_3(%arg0: i32) -> (i32, i32, i32) {
    %c0_i32 = arith.constant 0 : i32
    %c0_i32_0 = arith.constant 0 : i32
    %c0_i32_1 = arith.constant 0 : i32
    return %arg0, %c0_i32, %c0_i32_0 : i32, i32, i32
  }
}

module attributes {stable_mosaic.version = 11 : i64} {
  func.func @_fc_head_kernel(%arg0: i32, %arg1: memref<2x3456xbf16, #tpu.memory_space<vmem>>, %arg2: memref<3456x64xbf16, #tpu.memory_space<vmem>>, %arg3: memref<1x64xf32, #tpu.memory_space<vmem>>, %arg4: memref<64x6xbf16, #tpu.memory_space<vmem>>, %arg5: memref<1x6xf32, #tpu.memory_space<vmem>>, %arg6: memref<2x6xf32, #tpu.memory_space<vmem>>, %arg7: memref<2x64xf32, #tpu.memory_space<vmem>>) attributes {dimension_semantics = [#tpu.dimension_semantics<arbitrary>], iteration_bounds = array<i64: 3>, scalar_prefetch = 0 : i64, scratch_operands = 1 : i64, tpu.core_type = #tpu.core_type<tc>, window_params = [{transform_indices = @transform_0, window_bounds = array<i64: 2, 3456>}, {transform_indices = @transform_1, window_bounds = array<i64: 3456, 64>}, {pipeline_mode = #tpu.pipeline_mode<synchronous>, transform_indices = @transform_2, window_bounds = array<i64: 1, 64>}, {pipeline_mode = #tpu.pipeline_mode<synchronous>, transform_indices = @transform_3, window_bounds = array<i64: 64, 6>}, {pipeline_mode = #tpu.pipeline_mode<synchronous>, transform_indices = @transform_4, window_bounds = array<i64: 1, 6>}, {pipeline_mode = #tpu.pipeline_mode<synchronous>, transform_indices = @transform_5, window_bounds = array<i64: 2, 6>}]} {
    %c0_i32 = arith.constant 0 : i32
    %0 = arith.cmpi eq, %arg0, %c0_i32 : i32
    %1 = arith.extui %0 : i1 to i32
    %c0_i32_0 = arith.constant 0 : i32
    %2 = arith.cmpi ne, %1, %c0_i32_0 : i32
    scf.if %2 {
      %cst_9 = arith.constant 0.000000e+00 : f32
      %12 = vector.broadcast %cst_9 : f32 to vector<2x64xf32>
      %c0_10 = arith.constant 0 : index
      %c0_11 = arith.constant 0 : index
      %13 = vector.load %arg7[%c0_10, %c0_11] : memref<2x64xf32, #tpu.memory_space<vmem>>, vector<2x64xf32>
      tpu.vector_store %arg7[%c0_10, %c0_11], %12 {strides = array<i32>} : memref<2x64xf32, #tpu.memory_space<vmem>>, vector<2x64xf32>,
    } else {
    }
    %c0 = arith.constant 0 : index
    %c0_1 = arith.constant 0 : index
    %3 = vector.load %arg7[%c0, %c0_1] : memref<2x64xf32, #tpu.memory_space<vmem>>, vector<2x64xf32>
    %c0_2 = arith.constant 0 : index
    %c0_3 = arith.constant 0 : index
    %4 = vector.load %arg1[%c0_2, %c0_3] : memref<2x3456xbf16, #tpu.memory_space<vmem>>, vector<2x3456xbf16>
    %c0_4 = arith.constant 0 : index
    %c0_5 = arith.constant 0 : index
    %5 = vector.load %arg2[%c0_4, %c0_5] : memref<3456x64xbf16, #tpu.memory_space<vmem>>, vector<3456x64xbf16>
    %cst = arith.constant dense<0.000000e+00> : vector<2x64xf32>
    %6 = tpu.matmul %4, %5, %cst {dimension_numbers = #tpu.dot_dimension_numbers<[1], [0], [0], [1], [0, 0, 1, 1], [], []>} : vector<2x3456xbf16>, vector<3456x64xbf16>, vector<2x64xf32> -> vector<2x64xf32>
    %7 = arith.addf %3, %6 : vector<2x64xf32>
    %c0_6 = arith.constant 0 : index
    %c0_7 = arith.constant 0 : index
    %8 = vector.load %arg7[%c0_6, %c0_7] : memref<2x64xf32, #tpu.memory_space<vmem>>, vector<2x64xf32>
    tpu.vector_store %arg7[%c0_6, %c0_7], %7 {strides = array<i32>} : memref<2x64xf32, #tpu.memory_space<vmem>>, vector<2x64xf32>,
    %c2_i32 = arith.constant 2 : i32
    %9 = arith.cmpi eq, %arg0, %c2_i32 : i32
    %10 = arith.extui %9 : i1 to i32
    %c0_i32_8 = arith.constant 0 : i32
    %11 = arith.cmpi ne, %10, %c0_i32_8 : i32
    scf.if %11 {
      %c0_9 = arith.constant 0 : index
      %c0_10 = arith.constant 0 : index
      %12 = vector.load %arg7[%c0_9, %c0_10] : memref<2x64xf32, #tpu.memory_space<vmem>>, vector<2x64xf32>
      %c0_11 = arith.constant 0 : index
      %c0_12 = arith.constant 0 : index
      %13 = vector.load %arg3[%c0_11, %c0_12] : memref<1x64xf32, #tpu.memory_space<vmem>>, vector<1x64xf32>
      %14 = vector.broadcast %13 : vector<1x64xf32> to vector<2x64xf32>
      %15 = arith.addf %12, %14 : vector<2x64xf32>
      %cst_13 = arith.constant 0.000000e+00 : f32
      %16 = vector.broadcast %cst_13 : f32 to vector<2x64xf32>
      %17 = arith.maximumf %15, %16 : vector<2x64xf32>
      %18 = arith.truncf %17 : vector<2x64xf32> to vector<2x64xbf16>
      %c0_14 = arith.constant 0 : index
      %c0_15 = arith.constant 0 : index
      %19 = vector.load %arg4[%c0_14, %c0_15] : memref<64x6xbf16, #tpu.memory_space<vmem>>, vector<64x6xbf16>
      %cst_16 = arith.constant dense<0.000000e+00> : vector<2x6xf32>
      %20 = tpu.matmul %18, %19, %cst_16 {dimension_numbers = #tpu.dot_dimension_numbers<[1], [0], [0], [1], [0, 0, 1, 1], [], []>} : vector<2x64xbf16>, vector<64x6xbf16>, vector<2x6xf32> -> vector<2x6xf32>
      %c0_17 = arith.constant 0 : index
      %c0_18 = arith.constant 0 : index
      %21 = vector.load %arg5[%c0_17, %c0_18] : memref<1x6xf32, #tpu.memory_space<vmem>>, vector<1x6xf32>
      %22 = vector.broadcast %21 : vector<1x6xf32> to vector<2x6xf32>
      %23 = arith.addf %20, %22 : vector<2x6xf32>
      %c0_19 = arith.constant 0 : index
      %c0_20 = arith.constant 0 : index
      %24 = vector.load %arg6[%c0_19, %c0_20] : memref<2x6xf32, #tpu.memory_space<vmem>>, vector<2x6xf32>
      tpu.vector_store %arg6[%c0_19, %c0_20], %23 {strides = array<i32>} : memref<2x6xf32, #tpu.memory_space<vmem>>, vector<2x6xf32>,
    } else {
    }
    return
  }
  func.func @transform_0(%arg0: i32) -> (i32, i32) {
    %c0_i32 = arith.constant 0 : i32
    %c0_i32_0 = arith.constant 0 : i32
    return %c0_i32, %arg0 : i32, i32
  }
  func.func @transform_1(%arg0: i32) -> (i32, i32) {
    %c0_i32 = arith.constant 0 : i32
    %c0_i32_0 = arith.constant 0 : i32
    return %arg0, %c0_i32 : i32, i32
  }
  func.func @transform_2(%arg0: i32) -> (i32, i32) {
    %c0_i32 = arith.constant 0 : i32
    %c0_i32_0 = arith.constant 0 : i32
    %c0_i32_1 = arith.constant 0 : i32
    return %c0_i32, %c0_i32_0 : i32, i32
  }
  func.func @transform_3(%arg0: i32) -> (i32, i32) {
    %c0_i32 = arith.constant 0 : i32
    %c0_i32_0 = arith.constant 0 : i32
    %c0_i32_1 = arith.constant 0 : i32
    return %c0_i32, %c0_i32_0 : i32, i32
  }
  func.func @transform_4(%arg0: i32) -> (i32, i32) {
    %c0_i32 = arith.constant 0 : i32
    %c0_i32_0 = arith.constant 0 : i32
    %c0_i32_1 = arith.constant 0 : i32
    return %c0_i32, %c0_i32_0 : i32, i32
  }
  func.func @transform_5(%arg0: i32) -> (i32, i32) {
    %c0_i32 = arith.constant 0 : i32
    %c0_i32_0 = arith.constant 0 : i32
    %c0_i32_1 = arith.constant 0 : i32
    return %c0_i32, %c0_i32_0 : i32, i32
  }
}

</mosaic_0001>

<bundles_post_ra>
// kernel: dqn_forward.3
= control target key start
LH: loop header
LB: loop body
LE: loop exit
PB: predicated region body
PF: predicated region fallthrough
CT: control target
= control target key end

     0   :  { %s1755_s12 = smov 0   ;;  %s2007_s0 = inlined_call_operand.vmem [shape: bf16[2,192,1408], index: 0, kind: input, shape index: {}]   ;;  %s2008_s1 = inlined_call_operand.vmem [shape: bf16[16,192], index: 1, kind: input, shape index: {}]   ;;  %s2009_s2 = inlined_call_operand.vmem [shape: f32[16,1], index: 2, kind: input, shape index: {}]   ;;  %s2010_s3 = inlined_call_operand.vmem [shape: f32[2,16,1408], index: 3, kind: output, shape index: {}]  }
   0x1 LB: > { %s1370_s13 = sadd.s32 4294967295, %s1732_s12   ;;  %p1374_p0 = scmp.ge.s32.totalorder %s1732_s12, 1  ;;  %s1732_s12 = sphi %s1755_s12, %s13_s12  }
   0x2   : > { %p137_p1 = scmp.lt.s32.totalorder %s1732_s12, 3 }
   0x4   : > { %p138_p2 = pnand %p1374_p0, %p137_p1 }
   0x5   : > { %p161_p3 = scmp.lt.s32.totalorder (!%p138_p2), %s1370_s13, 1 }
   0x6   : > { %141 = sbr.rel (%p138_p2) target bundleno = 364 (0x16c), region = 32 }
   0xb   : > { %v1766_v0 = vld [vmem:[%s2008_s1 + $0x4] ss:$8 sps:$4 sm:$0xff]   ;;  %vm1011_vm0 = vcmask 523264   ;;  %s2012_s13 = smov (!%p161_p3, %s1370_s13), 1  ;;  %v1734_v2 = vmov 0  }
   0xc   : > { %v318_v1 = vld [vmem:[%s2009_s2] sm:$0xff]  ;;  %1511 = vmatprep.mubr.msk.bf16.mxu0 %vm1011_vm0, %v1766_v0  ;;  %1512 = vmatprep.mubr.msk.bf16.mxu1 %vm1011_vm0, %v1766_v0  ;;  %s1519_s18 = smul.u32 1056, %s2012_s13  ;;  %v319_v3 = vld [vmem:[%s2009_s2 + $0x8] sm:$0xff] }
   0xd   : > { %1530 = vset.pattern.permute.xlu0 %v1734_v2  ;;  %v1840_v54 = vld [vmem:[%s2008_s1] ss:$8 sps:$4 sm:$0xff]   ;;  %s1520_s26 = smul.u32 176, %s2012_s13 }
   0xe   : > { %322 = vperm.xlu0 %1530, %v318_v1   ;;  %s1785_s23 = scalar_lea.vmem %s2007_s0, %s1519_s18 }
   0xf   : > { %v1531_v4 = vld [vmem:[%s1785_s23 + $0x26c] ss:$44 sps:$4 sm:$0xff]   ;;  %v1533_v5 = vld [vmem:[%s1785_s23 + $0x274] ss:$44 sps:$4 sm:$0xff]   ;;  %v1536_v7 = vld [vmem:[%s1785_s23 + $0x270] ss:$44 sps:$4 sm:$0xff]   ;;  %s1960_s29 = scalar_lea.vmem %s2010_s3, %s1520_s26 }
  0x10   : > { %1015 = vmatprep.subr.bf16.mxu0 %v1531_v4  ;;  %v1535_v6 = vld [vmem:[%s1785_s23 + $0x268] ss:$44 sps:$4 sm:$0xff]   ;;  %1058 = vmatprep.subr.bf16.mxu1 %v1533_v5  ;;  %v1541_v10 = vld [vmem:[%s1785_s23 + $0x210] ss:$44 sps:$4 sm:$0xff]   ;;  %v1542_v11 = vld [vmem:[%s1785_s23 + $0x218] ss:$44 sps:$4 sm:$0xff]  }
  0x11   : > { %v1537_v8 = vld [vmem:[%s1785_s23 + $0x214] ss:$44 sps:$4 sm:$0xff]   ;;  %1016 = vmatpush1.bf16.msra.mxu0 %v1535_v6  ;;  %1059 = vmatpush1.bf16.msra.mxu1 %v1536_v7  ;;  %v1539_v9 = vld [vmem:[%s1785_s23 + $0x21c] ss:$44 sps:$4 sm:$0xff]   ;;  %v1545_v13 = vld [vmem:[%s1785_s23 + $0x1c4] ss:$44 sps:$4 sm:$0xff]  }
  0x12   : > { %327 = vperm.xlu0 %1530, %v319_v3   ;;  %1017 = vmatprep.subr.bf16.mxu0 %v1537_v8  ;;  %v1543_v12 = vld [vmem:[%s1785_s23 + $0x1bc] ss:$44 sps:$4 sm:$0xff]   ;;  %v1547_v14 = vld [vmem:[%s1785_s23 + $0x1b8] ss:$44 sps:$4 sm:$0xff]   ;;  %v1548_v15 = vld [vmem:[%s1785_s23 + $0x1c0] ss:$44 sps:$4 sm:$0xff]  }
  0x13   : > { %1060 = vmatprep.subr.bf16.mxu1 %v1539_v9  ;;  %v1549_v16 = vld [vmem:[%s1785_s23 + $0x164] ss:$44 sps:$4 sm:$0xff]   ;;  %v1551_v17 = vld [vmem:[%s1785_s23 + $0x16c] ss:$44 sps:$4 sm:$0xff]   ;;  %v1554_v19 = vld [vmem:[%s1785_s23 + $0x168] ss:$44 sps:$4 sm:$0xff]  }
  0x14   : > { %v1553_v18 = vld [vmem:[%s1785_s23 + $0x160] ss:$44 sps:$4 sm:$0xff]   ;;  %v1559_v22 = vld [vmem:[%s1785_s23 + $0x108] ss:$44 sps:$4 sm:$0xff]   ;;  %v1560_v23 = vld [vmem:[%s1785_s23 + $0x110] ss:$44 sps:$4 sm:$0xff]  }
  0x15   : > { %1018 = vmatpush1.bf16.msra.mxu0 %v1541_v10  ;;  %1061 = vmatpush1.bf16.msra.mxu1 %v1542_v11  ;;  %v1555_v20 = vld [vmem:[%s1785_s23 + $0x10c] ss:$44 sps:$4 sm:$0xff]   ;;  %v1557_v21 = vld [vmem:[%s1785_s23 + $0x114] ss:$44 sps:$4 sm:$0xff]   ;;  %v1563_v25 = vld [vmem:[%s1785_s23 + $0xbc] ss:$44 sps:$4 sm:$0xff]  }
  0x16   : > { %1019 = vmatprep.subr.bf16.mxu0 %v1543_v12  ;;  %1062 = vmatprep.subr.bf16.mxu1 %v1545_v13  ;;  %v1561_v24 = vld [vmem:[%s1785_s23 + $0xb4] ss:$44 sps:$4 sm:$0xff]   ;;  %v1565_v26 = vld [vmem:[%s1785_s23 + $0xb0] ss:$44 sps:$4 sm:$0xff]   ;;  %v1566_v27 = vld [vmem:[%s1785_s23 + $0xb8] ss:$44 sps:$4 sm:$0xff]  }
  0x17   : > { %v1567_v28 = vld [vmem:[%s1785_s23 + $0x5c] ss:$44 sps:$4 sm:$0xff]   ;;  %v1569_v29 = vld [vmem:[%s1785_s23 + $0x64] ss:$44 sps:$4 sm:$0xff]   ;;  %v1572_v31 = vld [vmem:[%s1785_s23 + $0x60] ss:$44 sps:$4 sm:$0xff]  }
  0x18   : > { %v1571_v30 = vld [vmem:[%s1785_s23 + $0x58] ss:$44 sps:$4 sm:$0xff]   ;;  %v1577_v34 = vld [vmem:[%s1785_s23] ss:$44 sps:$4 sm:$0xff]   ;;  %v1578_v35 = vld [vmem:[%s1785_s23 + $0x8] ss:$44 sps:$4 sm:$0xff]  }
  0x19   : > { %1020 = vmatpush1.bf16.msra.mxu0 %v1547_v14  ;;  %1063 = vmatpush1.bf16.msra.mxu1 %v1548_v15  ;;  %v1573_v32 = vld [vmem:[%s1785_s23 + $0x4] ss:$44 sps:$4 sm:$0xff]   ;;  %v1575_v33 = vld [vmem:[%s1785_s23 + $0xc] ss:$44 sps:$4 sm:$0xff]   ;;  %v1581_v37 = vld [vmem:[%s1785_s23 + $0x3d4] ss:$44 sps:$4 sm:$0xff]  }
  0x1a   : > { %1021 = vmatprep.subr.bf16.mxu0 %v1549_v16  ;;  %1064 = vmatprep.subr.bf16.mxu1 %v1551_v17  ;;  %v1579_v36 = vld [vmem:[%s1785_s23 + $0x3cc] ss:$44 sps:$4 sm:$0xff]   ;;  %v1583_v38 = vld [vmem:[%s1785_s23 + $0x3c8] ss:$44 sps:$4 sm:$0xff]   ;;  %v1584_v39 = vld [vmem:[%s1785_s23 + $0x3d0] ss:$44 sps:$4 sm:$0xff]  }
  0x1b   : > { %v1585_v40 = vld [vmem:[%s1785_s23 + $0x374] ss:$44 sps:$4 sm:$0xff]   ;;  %v1587_v41 = vld [vmem:[%s1785_s23 + $0x37c] ss:$44 sps:$4 sm:$0xff]   ;;  %v1590_v43 = vld [vmem:[%s1785_s23 + $0x378] ss:$44 sps:$4 sm:$0xff]  }
  0x1c   : > { %v1589_v42 = vld [vmem:[%s1785_s23 + $0x370] ss:$44 sps:$4 sm:$0xff]   ;;  %v1595_v46 = vld [vmem:[%s1785_s23 + $0x318] ss:$44 sps:$4 sm:$0xff]   ;;  %v1596_v47 = vld [vmem:[%s1785_s23 + $0x320] ss:$44 sps:$4 sm:$0xff]  }
  0x1d   : > { %1022 = vmatpush1.bf16.msra.mxu0 %v1553_v18  ;;  %1065 = vmatpush1.bf16.msra.mxu1 %v1554_v19  ;;  %v1591_v44 = vld [vmem:[%s1785_s23 + $0x31c] ss:$44 sps:$4 sm:$0xff]   ;;  %v1593_v45 = vld [vmem:[%s1785_s23 + $0x324] ss:$44 sps:$4 sm:$0xff]   ;;  %v1599_v49 = vld [vmem:[%s1785_s23 + $0x2cc] ss:$44 sps:$4 sm:$0xff]  }
  0x1e   : > { %1023 = vmatprep.subr.bf16.mxu0 %v1555_v20  ;;  %1066 = vmatprep.subr.bf16.mxu1 %v1557_v21  ;;  %v1597_v48 = vld [vmem:[%s1785_s23 + $0x2c4] ss:$44 sps:$4 sm:$0xff]   ;;  %v1601_v50 = vld [vmem:[%s1785_s23 + $0x2c0] ss:$44 sps:$4 sm:$0xff]   ;;  %v1602_v51 = vld [vmem:[%s1785_s23 + $0x2c8] ss:$44 sps:$4 sm:$0xff]  }
  0x1f   : > { %v1608_v52 = vld [vmem:[%s1785_s23 + $0x27c] ss:$44 sps:$4 sm:$0xff]   ;;  %v1611_v53 = vld [vmem:[%s1785_s23 + $0x284] ss:$44 sps:$4 sm:$0xff]   ;;  %v1609_v56 = vld [vmem:[%s1785_s23 + $0x280] ss:$44 sps:$4 sm:$0xff]  }
  0x20   : > { %v1606_v55 = vld [vmem:[%s1785_s23 + $0x278] ss:$44 sps:$4 sm:$0xff]   ;;  %v1612_v59 = vld [vmem:[%s1785_s23 + $0x220] ss:$44 sps:$4 sm:$0xff]   ;;  %v1615_v60 = vld [vmem:[%s1785_s23 + $0x228] ss:$44 sps:$4 sm:$0xff]  }
  0x21   : > { %1024 = vmatpush1.bf16.msra.mxu0 %v1559_v22  ;;  %1067 = vmatpush1.bf16.msra.mxu1 %v1560_v23  ;;  %v1614_v57 = vld [vmem:[%s1785_s23 + $0x224] ss:$44 sps:$4 sm:$0xff]   ;;  %v1617_v58 = vld [vmem:[%s1785_s23 + $0x22c] ss:$44 sps:$4 sm:$0xff]   ;;  %v1623_v62 = vld [vmem:[%s1785_s23 + $0x1d4] ss:$44 sps:$4 sm:$0xff]  }
  0x22   : > { %1025 = vmatprep.subr.bf16.mxu0 %v1561_v24  ;;  %1068 = vmatprep.subr.bf16.mxu1 %v1563_v25  ;;  %v1620_v61 = vld [vmem:[%s1785_s23 + $0x1cc] ss:$44 sps:$4 sm:$0xff]   ;;  %v1618_v63 = vld [vmem:[%s1785_s23 + $0x1c8] ss:$44 sps:$4 sm:$0xff]   ;;  %v1621_v1 = vld [vmem:[%s1785_s23 + $0x1d0] ss:$44 sps:$4 sm:$0xff]  }
  0x23   : > { %v1626_v3 = vld [vmem:[%s1785_s23 + $0x174] ss:$44 sps:$4 sm:$0xff]   ;;  %v1629_v4 = vld [vmem:[%s1785_s23 + $0x17c] ss:$44 sps:$4 sm:$0xff]   ;;  %v1627_v6 = vld [vmem:[%s1785_s23 + $0x178] ss:$44 sps:$4 sm:$0xff]  }
  0x24   : > { %v1624_v5 = vld [vmem:[%s1785_s23 + $0x170] ss:$44 sps:$4 sm:$0xff]   ;;  %v1630_v9 = vld [vmem:[%s1785_s23 + $0x118] ss:$44 sps:$4 sm:$0xff]   ;;  %v1633_v10 = vld [vmem:[%s1785_s23 + $0x120] ss:$44 sps:$4 sm:$0xff]  }
  0x25   : > { %1026 = vmatpush1.bf16.msra.mxu0 %v1565_v26  ;;  %1069 = vmatpush1.bf16.msra.mxu1 %v1566_v27  ;;  %v1632_v7 = vld [vmem:[%s1785_s23 + $0x11c] ss:$44 sps:$4 sm:$0xff]   ;;  %v1635_v8 = vld [vmem:[%s1785_s23 + $0x124] ss:$44 sps:$4 sm:$0xff]   ;;  %v1641_v12 = vld [vmem:[%s1785_s23 + $0xcc] ss:$44 sps:$4 sm:$0xff]  }
  0x26   : > { %1027 = vmatprep.subr.bf16.mxu0 %v1567_v28  ;;  %1070 = vmatprep.subr.bf16.mxu1 %v1569_v29  ;;  %v1638_v11 = vld [vmem:[%s1785_s23 + $0xc4] ss:$44 sps:$4 sm:$0xff]   ;;  %v1636_v13 = vld [vmem:[%s1785_s23 + $0xc0] ss:$44 sps:$4 sm:$0xff]   ;;  %v1639_v14 = vld [vmem:[%s1785_s23 + $0xc8] ss:$44 sps:$4 sm:$0xff]  }
  0x27   : > { %v1644_v15 = vld [vmem:[%s1785_s23 + $0x6c] ss:$44 sps:$4 sm:$0xff]   ;;  %v1647_v16 = vld [vmem:[%s1785_s23 + $0x74] ss:$44 sps:$4 sm:$0xff]   ;;  %v1645_v18 = vld [vmem:[%s1785_s23 + $0x70] ss:$44 sps:$4 sm:$0xff]  }
  0x28   : > { %v1642_v17 = vld [vmem:[%s1785_s23 + $0x68] ss:$44 sps:$4 sm:$0xff]   ;;  %v1648_v21 = vld [vmem:[%s1785_s23 + $0x10] ss:$44 sps:$4 sm:$0xff]   ;;  %v1651_v22 = vld [vmem:[%s1785_s23 + $0x18] ss:$44 sps:$4 sm:$0xff]  }
  0x29   : > { %1028 = vmatpush1.bf16.msra.mxu0 %v1571_v30  ;;  %1071 = vmatpush1.bf16.msra.mxu1 %v1572_v31  ;;  %v1650_v19 = vld [vmem:[%s1785_s23 + $0x14] ss:$44 sps:$4 sm:$0xff]   ;;  %v1653_v20 = vld [vmem:[%s1785_s23 + $0x1c] ss:$44 sps:$4 sm:$0xff]   ;;  %v1659_v24 = vld [vmem:[%s1785_s23 + $0x3e4] ss:$44 sps:$4 sm:$0xff]  }
  0x2a   : > { %1029 = vmatprep.subr.bf16.mxu0 %v1573_v32  ;;  %1072 = vmatprep.subr.bf16.mxu1 %v1575_v33  ;;  %v1656_v23 = vld [vmem:[%s1785_s23 + $0x3dc] ss:$44 sps:$4 sm:$0xff]   ;;  %v1654_v25 = vld [vmem:[%s1785_s23 + $0x3d8] ss:$44 sps:$4 sm:$0xff]   ;;  %v1657_v26 = vld [vmem:[%s1785_s23 + $0x3e0] ss:$44 sps:$4 sm:$0xff]  }
  0x2b   : > { %v1662_v27 = vld [vmem:[%s1785_s23 + $0x384] ss:$44 sps:$4 sm:$0xff]   ;;  %v1665_v28 = vld [vmem:[%s1785_s23 + $0x38c] ss:$44 sps:$4 sm:$0xff]   ;;  %v1663_v30 = vld [vmem:[%s1785_s23 + $0x388] ss:$44 sps:$4 sm:$0xff]  }
  0x2c   : > { %v1660_v29 = vld [vmem:[%s1785_s23 + $0x380] ss:$44 sps:$4 sm:$0xff]   ;;  %v1666_v33 = vld [vmem:[%s1785_s23 + $0x328] ss:$44 sps:$4 sm:$0xff]  }
  0x2d   : > { %1030 = vmatpush1.bf16.msra.mxu0 %v1577_v34  ;;  %1073 = vmatpush1.bf16.msra.mxu1 %v1578_v35  ;;  %v1668_v31 = vld [vmem:[%s1785_s23 + $0x32c] ss:$44 sps:$4 sm:$0xff]   ;;  %v1671_v32 = vld [vmem:[%s1785_s23 + $0x334] ss:$44 sps:$4 sm:$0xff]   ;;  %v1669_v34 = vld [vmem:[%s1785_s23 + $0x330] ss:$44 sps:$4 sm:$0xff]  }
  0x2e   : > { %1039 = vmatprep.subr.bf16.mxu0 %v1579_v36  ;;  %1082 = vmatprep.subr.bf16.mxu1 %v1581_v37  ;;  %v1674_v35 = vld [vmem:[%s1785_s23 + $0x2d4] ss:$44 sps:$4 sm:$0xff]   ;;  %v1677_v36 = vld [vmem:[%s1785_s23 + $0x2dc] ss:$44 sps:$4 sm:$0xff]  }
  0x2f   : > { %v1672_v37 = vld [vmem:[%s1785_s23 + $0x2d0] ss:$44 sps:$4 sm:$0xff]  }
  0x31   : > { %1040 = vmatpush2.bf16.msra.mxu0 %v1583_v38  ;;  %1083 = vmatpush2.bf16.msra.mxu1 %v1584_v39  ;;  %v1675_v38 = vld [vmem:[%s1785_s23 + $0x2d8] ss:$44 sps:$4 sm:$0xff]  }
  0x32   : > { %1041 = vmatprep.subr.bf16.mxu0 %v1585_v40  ;;  %1084 = vmatprep.subr.bf16.mxu1 %v1587_v41  ;;  %v1680_v39 = vld [vmem:[%s1785_s23 + $0x28c] ss:$44 sps:$4 sm:$0xff]   ;;  %v1678_v40 = vld [vmem:[%s1785_s23 + $0x288] ss:$44 sps:$4 sm:$0xff]   ;;  %v1681_v41 = vld [vmem:[%s1785_s23 + $0x290] ss:$44 sps:$4 sm:$0xff]  }
  0x35   : > { %1042 = vmatpush2.bf16.msra.mxu0 %v1589_v42  ;;  %1085 = vmatpush2.bf16.msra.mxu1 %v1590_v43  ;;  %v1684_v42 = vld [vmem:[%s1785_s23 + $0x234] ss:$44 sps:$4 sm:$0xff]   ;;  %v1682_v43 = vld [vmem:[%s1785_s23 + $0x230] ss:$44 sps:$4 sm:$0xff]  }
  0x36   : > { %1043 = vmatprep.subr.bf16.mxu0 %v1591_v44  ;;  %1086 = vmatprep.subr.bf16.mxu1 %v1593_v45  ;;  %v1685_v44 = vld [vmem:[%s1785_s23 + $0x238] ss:$44 sps:$4 sm:$0xff]   ;;  %v1688_v45 = vld [vmem:[%s1785_s23 + $0x1dc] ss:$44 sps:$4 sm:$0xff]  }
  0x39   : > { %1044 = vmatpush2.bf16.msra.mxu0 %v1595_v46  ;;  %1087 = vmatpush2.bf16.msra.mxu1 %v1596_v47  ;;  %v1686_v46 = vld [vmem:[%s1785_s23 + $0x1d8] ss:$44 sps:$4 sm:$0xff]   ;;  %v1689_v47 = vld [vmem:[%s1785_s23 + $0x1e0] ss:$44 sps:$4 sm:$0xff]  }
  0x3a   : > { %1045 = vmatprep.subr.bf16.mxu0 %v1597_v48  ;;  %1088 = vmatprep.subr.bf16.mxu1 %v1599_v49  ;;  %v1692_v48 = vld [vmem:[%s1785_s23 + $0x184] ss:$44 sps:$4 sm:$0xff]   ;;  %v1690_v49 = vld [vmem:[%s1785_s23 + $0x180] ss:$44 sps:$4 sm:$0xff]  }
  0x3d   : > { %1046 = vmatpush2.bf16.msra.mxu0 %v1601_v50  ;;  %1089 = vmatpush2.bf16.msra.mxu1 %v1602_v51  ;;  %v1693_v50 = vld [vmem:[%s1785_s23 + $0x188] ss:$44 sps:$4 sm:$0xff]  }
  0x3e   : > { %1101 = vmatprep.subr.bf16.mxu0 %v1608_v52  ;;  %1144 = vmatprep.subr.bf16.mxu1 %v1611_v53  ;;  %v1694_v51 = vld [vmem:[%s1785_s23 + $0x128] ss:$44 sps:$4 sm:$0xff]   ;;  %v1697_v52 = vld [vmem:[%s1785_s23 + $0x130] ss:$44 sps:$4 sm:$0xff]  }
  0x3f   : > { %v1700_v53 = vld [vmem:[%s1785_s23 + $0xd4] ss:$44 sps:$4 sm:$0xff]  }
  0x40   : > { %1048 = vmatmul.mubr.bf16.vlgmr.msra.gmra.mxu0 %v1840_v54  ;;  %1091 = vmatmul.mubr.bf16.vlgmr.msra.gmra.mxu1 %v1840_v54 }
  0x41   : > { %1102 = vmatpush1.bf16.msra.mxu0 %v1606_v55  ;;  %1145 = vmatpush1.bf16.msra.mxu1 %v1609_v56  ;;  %v1698_v55 = vld [vmem:[%s1785_s23 + $0xd0] ss:$44 sps:$4 sm:$0xff]   ;;  %v1701_v56 = vld [vmem:[%s1785_s23 + $0xd8] ss:$44 sps:$4 sm:$0xff]  }
  0x42   : > { %1103 = vmatprep.subr.bf16.mxu0 %v1614_v57  ;;  %1146 = vmatprep.subr.bf16.mxu1 %v1617_v58  ;;  %v1704_v57 = vld [vmem:[%s1785_s23 + $0x7c] ss:$44 sps:$4 sm:$0xff]   ;;  %v1702_v58 = vld [vmem:[%s1785_s23 + $0x78] ss:$44 sps:$4 sm:$0xff]  }
  0x43   : > { %1513 = vmatprep.mubr.msk.bf16.mxu0 %vm1011_vm0, %v1766_v0  ;;  %1514 = vmatprep.mubr.msk.bf16.mxu1 %vm1011_vm0, %v1766_v0 }
  0x45   : > { %1104 = vmatpush1.bf16.msra.mxu0 %v1612_v59  ;;  %1147 = vmatpush1.bf16.msra.mxu1 %v1615_v60  ;;  %v1705_v59 = vld [vmem:[%s1785_s23 + $0x80] ss:$44 sps:$4 sm:$0xff]   ;;  %v1708_v60 = vld [vmem:[%s1785_s23 + $0x24] ss:$44 sps:$4 sm:$0xff]  }
  0x46   : > { %1105 = vmatprep.subr.bf16.mxu0 %v1620_v61  ;;  %1148 = vmatprep.subr.bf16.mxu1 %v1623_v62  ;;  %v1706_v61 = vld [vmem:[%s1785_s23 + $0x20] ss:$44 sps:$4 sm:$0xff]   ;;  %v1709_v62 = vld [vmem:[%s1785_s23 + $0x28] ss:$44 sps:$4 sm:$0xff]  }
  0x49   : > { %1106 = vmatpush1.bf16.msra.mxu0 %v1618_v63  ;;  %1149 = vmatpush1.bf16.msra.mxu1 %v1621_v1  ;;  %v1712_v63 = vld [vmem:[%s1785_s23 + $0x3ec] ss:$44 sps:$4 sm:$0xff]   ;;  %v1710_v1 = vld [vmem:[%s1785_s23 + $0x3e8] ss:$44 sps:$4 sm:$0xff]  }
  0x4a   : > { %1107 = vmatprep.subr.bf16.mxu0 %v1626_v3  ;;  %1150 = vmatprep.subr.bf16.mxu1 %v1629_v4  ;;  %v1713_v3 = vld [vmem:[%s1785_s23 + $0x3f0] ss:$44 sps:$4 sm:$0xff]   ;;  %v1716_v4 = vld [vmem:[%s1785_s23 + $0x394] ss:$44 sps:$4 sm:$0xff]  }
  0x4d   : > { %1108 = vmatpush1.bf16.msra.mxu0 %v1624_v5  ;;  %1151 = vmatpush1.bf16.msra.mxu1 %v1627_v6  ;;  %v1714_v5 = vld [vmem:[%s1785_s23 + $0x390] ss:$44 sps:$4 sm:$0xff]   ;;  %v1717_v6 = vld [vmem:[%s1785_s23 + $0x398] ss:$44 sps:$4 sm:$0xff]  }
  0x4e   : > { %1109 = vmatprep.subr.bf16.mxu0 %v1632_v7  ;;  %1152 = vmatprep.subr.bf16.mxu1 %v1635_v8  ;;  %v1720_v7 = vld [vmem:[%s1785_s23 + $0x33c] ss:$44 sps:$4 sm:$0xff]   ;;  %v1718_v8 = vld [vmem:[%s1785_s23 + $0x338] ss:$44 sps:$4 sm:$0xff]  }
  0x51   : > { %1110 = vmatpush1.bf16.msra.mxu0 %v1630_v9  ;;  %1153 = vmatpush1.bf16.msra.mxu1 %v1633_v10  ;;  %v1721_v9 = vld [vmem:[%s1785_s23 + $0x340] ss:$44 sps:$4 sm:$0xff]   ;;  %v1724_v10 = vld [vmem:[%s1785_s23 + $0x2e4] ss:$44 sps:$4 sm:$0xff]  }
  0x52   : > { %1111 = vmatprep.subr.bf16.mxu0 %v1638_v11  ;;  %1154 = vmatprep.subr.bf16.mxu1 %v1641_v12  ;;  %v1722_v11 = vld [vmem:[%s1785_s23 + $0x2e0] ss:$44 sps:$4 sm:$0xff]   ;;  %v1725_v12 = vld [vmem:[%s1785_s23 + $0x2e8] ss:$44 sps:$4 sm:$0xff]  }
  0x55   : > { %1112 = vmatpush1.bf16.msra.mxu0 %v1636_v13  ;;  %1155 = vmatpush1.bf16.msra.mxu1 %v1639_v14 }
  0x56   : > { %1113 = vmatprep.subr.bf16.mxu0 %v1644_v15  ;;  %1156 = vmatprep.subr.bf16.mxu1 %v1647_v16 }
  0x59   : > { %1114 = vmatpush1.bf16.msra.mxu0 %v1642_v17  ;;  %1157 = vmatpush1.bf16.msra.mxu1 %v1645_v18 }
  0x5a   : > { %1115 = vmatprep.subr.bf16.mxu0 %v1650_v19  ;;  %1158 = vmatprep.subr.bf16.mxu1 %v1653_v20 }
  0x5d   : > { %1116 = vmatpush1.bf16.msra.mxu0 %v1648_v21  ;;  %1159 = vmatpush1.bf16.msra.mxu1 %v1651_v22 }
  0x5e   : > { %1125 = vmatprep.subr.bf16.mxu0 %v1656_v23  ;;  %1168 = vmatprep.subr.bf16.mxu1 %v1659_v24 }
  0x61   : > { %1126 = vmatpush2.bf16.msra.mxu0 %v1654_v25  ;;  %1169 = vmatpush2.bf16.msra.mxu1 %v1657_v26 }
  0x62   : > { %1127 = vmatprep.subr.bf16.mxu0 %v1662_v27  ;;  %1170 = vmatprep.subr.bf16.mxu1 %v1665_v28 }
  0x65   : > { %1128 = vmatpush2.bf16.msra.mxu0 %v1660_v29  ;;  %1171 = vmatpush2.bf16.msra.mxu1 %v1663_v30 }
  0x66   : > { %1129 = vmatprep.subr.bf16.mxu0 %v1668_v31  ;;  %1172 = vmatprep.subr.bf16.mxu1 %v1671_v32 }
  0x69   : > { %1130 = vmatpush2.bf16.msra.mxu0 %v1666_v33  ;;  %1173 = vmatpush2.bf16.msra.mxu1 %v1669_v34 }
  0x6a   : > { %1131 = vmatprep.subr.bf16.mxu0 %v1674_v35  ;;  %1174 = vmatprep.subr.bf16.mxu1 %v1677_v36 }
  0x6d   : > { %1132 = vmatpush2.bf16.msra.mxu0 %v1672_v37  ;;  %1175 = vmatpush2.bf16.msra.mxu1 %v1675_v38 }
  0x6e   : > { %1187 = vmatprep.subr.bf16.mxu0 %v1680_v39  ;;  %1230 = vmatprep.subr.bf16.mxu1 %v1734_v2 }
  0x70   : > { %1134 = vmatmul.mubr.bf16.vlgmr.msra.gmra.mxu0 %v1840_v54  ;;  %1177 = vmatmul.mubr.bf16.vlgmr.msra.gmra.mxu1 %v1840_v54 }
  0x71   : > { %1188 = vmatpush1.bf16.msra.mxu0 %v1678_v40  ;;  %1231 = vmatpush1.bf16.msra.mxu1 %v1681_v41 }
  0x72   : > { %1189 = vmatprep.subr.bf16.mxu0 %v1684_v42  ;;  %1232 = vmatprep.subr.bf16.mxu1 %v1734_v2 }
  0x73   : > { %1515 = vmatprep.mubr.msk.bf16.mxu0 %vm1011_vm0, %v1766_v0  ;;  %1516 = vmatprep.mubr.msk.bf16.mxu1 %vm1011_vm0, %v1766_v0  ;;  %v1696_v0 = vld [vmem:[%s1785_s23 + $0x12c] ss:$44 sps:$4 sm:$0xff]  }
  0x75   : > { %1190 = vmatpush1.bf16.msra.mxu0 %v1682_v43  ;;  %1233 = vmatpush1.bf16.msra.mxu1 %v1685_v44 }
  0x76   : > { %1191 = vmatprep.subr.bf16.mxu0 %v1688_v45  ;;  %1234 = vmatprep.subr.bf16.mxu1 %v1734_v2 }
  0x79   : > { %1192 = vmatpush1.bf16.msra.mxu0 %v1686_v46  ;;  %1235 = vmatpush1.bf16.msra.mxu1 %v1689_v47 }
  0x7a   : > { %1193 = vmatprep.subr.bf16.mxu0 %v1692_v48  ;;  %1236 = vmatprep.subr.bf16.mxu1 %v1734_v2 }
  0x7d   : > { %1194 = vmatpush1.bf16.msra.mxu0 %v1690_v49  ;;  %1237 = vmatpush1.bf16.msra.mxu1 %v1693_v50 }
  0x7e   : > { %1195 = vmatprep.subr.bf16.mxu0 %v1696_v0  ;;  %1238 = vmatprep.subr.bf16.mxu1 %v1734_v2 }
  0x81   : > { %1196 = vmatpush1.bf16.msra.mxu0 %v1694_v51  ;;  %1239 = vmatpush1.bf16.msra.mxu1 %v1697_v52 }
  0x82   : > { %1197 = vmatprep.subr.bf16.mxu0 %v1700_v53  ;;  %1240 = vmatprep.subr.bf16.mxu1 %v1734_v2 }
  0x85   : > { %1198 = vmatpush1.bf16.msra.mxu0 %v1698_v55  ;;  %1241 = vmatpush1.bf16.msra.mxu1 %v1701_v56 }
  0x86   : > { %1199 = vmatprep.subr.bf16.mxu0 %v1704_v57  ;;  %1242 = vmatprep.subr.bf16.mxu1 %v1734_v2 }
  0x89   : > { %1200 = vmatpush1.bf16.msra.mxu0 %v1702_v58  ;;  %1243 = vmatpush1.bf16.msra.mxu1 %v1705_v59  ;;  %v1950_v13 = vpop.permute.xlu0 %322 }
  0x8a   : > { %1201 = vmatprep.subr.bf16.mxu0 %v1708_v60  ;;  %1244 = vmatprep.subr.bf16.mxu1 %v1734_v2 }
  0x8d   : > { %1202 = vmatpush1.bf16.msra.mxu0 %v1706_v61  ;;  %1245 = vmatpush1.bf16.msra.mxu1 %v1709_v62  ;;  %v1955_v18 = vpop.permute.xlu0 %327 }
  0x8e   : > { %1211 = vmatprep.subr.bf16.mxu0 %v1712_v63  ;;  %1254 = vmatprep.subr.bf16.mxu1 %v1734_v2 }
  0x91   : > { %1212 = vmatpush2.bf16.msra.mxu0 %v1710_v1  ;;  %1255 = vmatpush2.bf16.msra.mxu1 %v1713_v3 }
  0x92   : > { %1213 = vmatprep.subr.bf16.mxu0 %v1716_v4  ;;  %1256 = vmatprep.subr.bf16.mxu1 %v1734_v2 }
  0x95   : > { %1214 = vmatpush2.bf16.msra.mxu0 %v1714_v5  ;;  %1257 = vmatpush2.bf16.msra.mxu1 %v1717_v6 }
  0x96   : > { %1215 = vmatprep.subr.bf16.mxu0 %v1720_v7  ;;  %1258 = vmatprep.subr.bf16.mxu1 %v1734_v2 }
  0x99   : > { %1216 = vmatpush2.bf16.msra.mxu0 %v1718_v8  ;;  %1259 = vmatpush2.bf16.msra.mxu1 %v1721_v9 }
  0x9a   : > { %1217 = vmatprep.subr.bf16.mxu0 %v1724_v10  ;;  %1260 = vmatprep.subr.bf16.mxu1 %v1734_v2 }
  0x9d   : > { %1218 = vmatpush2.bf16.msra.mxu0 %v1722_v11  ;;  %1261 = vmatpush2.bf16.msra.mxu1 %v1725_v12 }
  0xa0   : > { %1220 = vmatmul.mubr.bf16.vlgmr.msra.gmra.mxu0 %v1840_v54  ;;  %1263 = vmatmul.mubr.bf16.vlgmr.msra.gmra.mxu1 %v1840_v54 }
 0x100   : > { %v1049_v14 = vpop.f32.mrf.mxu0  ;;  %v1092_v15 = vpop.f32.mrf.mxu1 }
 0x101   : > { %v1050_v16 = vadd.f32 %v1049_v14, %v1950_v13  ;;  %v1093_v17 = vadd.f32 %v1092_v15, %v1950_v13 }
 0x102   : > { %v1051_v2 = vpop.f32.mrf.mxu0  ;;  %v1094_v54 = vpop.f32.mrf.mxu1 }
 0x103   : > { %v1271_v19 = vmax.f32 %v1050_v16, 0.0  ;;  %v1273_v20 = vmax.f32 %v1093_v17, 0.0  ;;  %v1052_v21 = vadd.f32 %v1051_v2, %v1950_v13  ;;  %v1095_v22 = vadd.f32 %v1094_v54, %v1950_v13 }
 0x104   : > { %v1053_v23 = vpop.f32.mrf.mxu0  ;;  %v1096_v24 = vpop.f32.mrf.mxu1 }
 0x105   : > { %1293 = vst [vmem:[%s1960_s29] sm:$0xff] %v1271_v19  ;;  %1295 = vst [vmem:[%s1960_s29 + $0x10] sm:$0xff] %v1273_v20  ;;  %v1272_v25 = vmax.f32 %v1052_v21, 0.0  ;;  %v1274_v26 = vmax.f32 %v1095_v22, 0.0  ;;  %v1054_v27 = vadd.f32 %v1053_v23, %v1955_v18  ;;  %v1097_v28 = vadd.f32 %v1096_v24, %v1955_v18 }
 0x106   : > { %v1055_v29 = vpop.f32.mrf.mxu0  ;;  %v1098_v30 = vpop.f32.mrf.mxu1 }
 0x107   : > { %1294 = vst [vmem:[%s1960_s29 + $0x8] sm:$0xff] %v1272_v25  ;;  %1296 = vst [vmem:[%s1960_s29 + $0x18] sm:$0xff] %v1274_v26  ;;  %v1282_v31 = vmax.f32 %v1054_v27, 0.0  ;;  %v1284_v32 = vmax.f32 %v1097_v28, 0.0  ;;  %v1056_v33 = vadd.f32 %v1055_v29, %v1955_v18  ;;  %v1099_v34 = vadd.f32 %v1098_v30, %v1955_v18 }
 0x109   : > { %1304 = vst [vmem:[%s1960_s29 + $0x58] sm:$0xff] %v1282_v31  ;;  %1306 = vst [vmem:[%s1960_s29 + $0x68] sm:$0xff] %v1284_v32  ;;  %v1283_v35 = vmax.f32 %v1056_v33, 0.0  ;;  %v1285_v36 = vmax.f32 %v1099_v34, 0.0 }
 0x10b   : > { %1305 = vst [vmem:[%s1960_s29 + $0x60] sm:$0xff] %v1283_v35  ;;  %1307 = vst [vmem:[%s1960_s29 + $0x70] sm:$0xff] %v1285_v36 }
 0x130   : > { %v1135_v37 = vpop.f32.mrf.mxu0  ;;  %v1178_v38 = vpop.f32.mrf.mxu1 }
 0x131   : > { %v1136_v39 = vadd.f32 %v1135_v37, %v1950_v13  ;;  %v1179_v40 = vadd.f32 %v1178_v38, %v1950_v13 }
 0x132   : > { %v1137_v41 = vpop.f32.mrf.mxu0  ;;  %v1180_v42 = vpop.f32.mrf.mxu1 }
 0x133   : > { %v1275_v43 = vmax.f32 %v1136_v39, 0.0  ;;  %v1277_v44 = vmax.f32 %v1179_v40, 0.0  ;;  %v1138_v45 = vadd.f32 %v1137_v41, %v1950_v13  ;;  %v1181_v46 = vadd.f32 %v1180_v42, %v1950_v13 }
 0x134   : > { %v1139_v47 = vpop.f32.mrf.mxu0  ;;  %v1182_v48 = vpop.f32.mrf.mxu1 }
 0x135   : > { %1297 = vst [vmem:[%s1960_s29 + $0x20] sm:$0xff] %v1275_v43  ;;  %1299 = vst [vmem:[%s1960_s29 + $0x30] sm:$0xff] %v1277_v44  ;;  %v1276_v49 = vmax.f32 %v1138_v45, 0.0  ;;  %v1278_v50 = vmax.f32 %v1181_v46, 0.0  ;;  %v1140_v0 = vadd.f32 %v1139_v47, %v1955_v18  ;;  %v1183_v51 = vadd.f32 %v1182_v48, %v1955_v18 }
 0x136   : > { %v1141_v52 = vpop.f32.mrf.mxu0  ;;  %v1184_v53 = vpop.f32.mrf.mxu1 }
 0x137   : > { %1298 = vst [vmem:[%s1960_s29 + $0x28] sm:$0xff] %v1276_v49  ;;  %1300 = vst [vmem:[%s1960_s29 + $0x38] sm:$0xff] %v1278_v50  ;;  %v1286_v55 = vmax.f32 %v1140_v0, 0.0  ;;  %v1288_v56 = vmax.f32 %v1183_v51, 0.0  ;;  %v1142_v57 = vadd.f32 %v1141_v52, %v1955_v18  ;;  %v1185_v58 = vadd.f32 %v1184_v53, %v1955_v18 }
 0x139   : > { %1308 = vst [vmem:[%s1960_s29 + $0x78] sm:$0xff] %v1286_v55  ;;  %1310 = vst [vmem:[%s1960_s29 + $0x88] sm:$0xff] %v1288_v56  ;;  %v1287_v59 = vmax.f32 %v1142_v57, 0.0  ;;  %v1289_v60 = vmax.f32 %v1185_v58, 0.0 }
 0x13b   : > { %1309 = vst [vmem:[%s1960_s29 + $0x80] sm:$0xff] %v1287_v59  ;;  %1311 = vst [vmem:[%s1960_s29 + $0x90] sm:$0xff] %v1289_v60 }
 0x160   : > { %v1221_v61 = vpop.f32.mrf.mxu0  ;;  %v1264_v62 = vpop.f32.mrf.mxu1 }
 0x161   : > { %v1222_v63 = vadd.f32 %v1221_v61, %v1950_v13  ;;  %v1265_v1 = vadd.f32 %v1264_v62, %v1950_v13 }
 0x162   : > { %v1223_v3 = vpop.f32.mrf.mxu0  ;;  %v1266_v4 = vpop.f32.mrf.mxu1 }
 0x163   : > { %v1279_v5 = vmax.f32 %v1222_v63, 0.0  ;;  %v1281_v6 = vmax.f32 %v1265_v1, 0.0  ;;  %v1224_v7 = vadd.f32 %v1223_v3, %v1950_v13 }
 0x164   : > { %v1225_v8 = vpop.f32.mrf.mxu0  ;;  %v1267_v9 = vpop.f32.mrf.mxu1 }
 0x165   : > { %1301 = vst [vmem:[%s1960_s29 + $0x40] sm:$0xff] %v1279_v5  ;;  %1303 = vst [vmem:[%s1960_s29 + $0x50] sm:$0xff] %v1281_v6  ;;  %v1280_v10 = vmax.f32 %v1224_v7, 0.0  ;;  %v1226_v11 = vadd.f32 %v1225_v8, %v1955_v18  ;;  %v1268_v12 = vadd.f32 %v1267_v9, %v1955_v18 }
 0x166   : > { %v1227_v14 = vpop.f32.mrf.mxu0  ;;  %v1269_v15 = vpop.f32.mrf.mxu1 }
 0x167   : > { %1302 = vst [vmem:[%s1960_s29 + $0x48] sm:$0xff] %v1280_v10  ;;  %v1290_v16 = vmax.f32 %v1226_v11, 0.0  ;;  %v1292_v17 = vmax.f32 %v1268_v12, 0.0  ;;  %v1228_v2 = vadd.f32 %v1227_v14, %v1955_v18 }
 0x169   : > { %1312 = vst [vmem:[%s1960_s29 + $0x98] sm:$0xff] %v1290_v16  ;;  %1314 = vst [vmem:[%s1960_s29 + $0xa8] sm:$0xff] %v1292_v17  ;;  %v1291_v13 = vmax.f32 %v1228_v2, 0.0 }
 0x16b   : > { %1313 = vst [vmem:[%s1960_s29 + $0xa0] sm:$0xff] %v1291_v13 }
 0x16c PF: > { %s13_s12 = sadd.s32 1, %s1732_s12  }
 0x16d   : > { %p10_p4 = scmp.ge.s32.totalorder %s13_s12, 4  }
 0x16f   :  { %12 = sbr.rel (!%p10_p4) target bundleno = 1 (0x1), region = 62 }

// kernel: dqn_forward.4
= control target key start
LH: loop header
LB: loop body
LE: loop exit
PB: predicated region body
PF: predicated region fallthrough
CT: control target
= control target key end

     0   :  { %s714_s12 = smov 0   ;;  %s817_s0 = inlined_call_operand.vmem [shape: bf16[2,144,384], index: 0, kind: input, shape index: {}]   ;;  %s818_s1 = inlined_call_operand.vmem [shape: bf16[32,144], index: 1, kind: input, shape index: {}]   ;;  %s819_s2 = inlined_call_operand.vmem [shape: f32[32,1], index: 2, kind: input, shape index: {}]   ;;  %s820_s3 = inlined_call_operand.vmem [shape: f32[2,32,384], index: 3, kind: output, shape index: {}]  }
   0x1 LB: > { %s586_s13 = sadd.s32 4294967295, %s691_s12   ;;  %p590_p0 = scmp.ge.s32.totalorder %s691_s12, 1  ;;  %s691_s12 = sphi %s714_s12, %s13_s12  }
   0x2   : > { %p137_p1 = scmp.lt.s32.totalorder %s691_s12, 3 }
   0x4   : > { %p138_p2 = pnand %p590_p0, %p137_p1 }
   0x5   : > { %p161_p3 = scmp.lt.s32.totalorder (!%p138_p2), %s586_s13, 1 }
   0x6   : > { %141 = sbr.rel (%p138_p2) target bundleno = 264 (0x108), region = 32 }
   0xb   : > { %v693_v0 = vmov 0   ;;  %v681_v1 = vld [vmem:[%s818_s1 + $0x4] ss:$8 sps:$4 sm:$0xff]   ;;  %vm398_vm0 = vcmask 130048   ;;  %s822_s13 = smov (!%p161_p3, %s586_s13), 1  ;;  %v214_v3 = vld [vmem:[%s819_s2 + $0x10] sm:$0xff] }
   0xc   : > { %458 = vmatprep.subr.bf16.mxu1 %v693_v0  ;;  %641 = vset.pattern.permute.xlu0 %v693_v0  ;;  %v212_v2 = vld [vmem:[%s819_s2] sm:$0xff]  ;;  %s630_s20 = smul.u32 216, %s822_s13  ;;  %v213_v4 = vld [vmem:[%s819_s2 + $0x8] sm:$0xff]  ;;  %v215_v5 = vld [vmem:[%s819_s2 + $0x18] sm:$0xff] }
   0xd   : > { %642 = vset.pattern.permute.xlu1 %v693_v0  ;;  %626 = vmatprep.mubr.msk.bf16.mxu1 %vm398_vm0, %v681_v1  ;;  %v679_v33 = vld [vmem:[%s818_s1] ss:$8 sps:$4 sm:$0xff]   ;;  %v682_v34 = vld [vmem:[%s818_s1 + $0x14] ss:$8 sps:$4 sm:$0xff]   ;;  %v684_v35 = vld [vmem:[%s818_s1 + $0x10] ss:$8 sps:$4 sm:$0xff]  }
   0xe   : > { %624 = vmatprep.mubr.msk.bf16.mxu0 %vm398_vm0, %v681_v1  ;;  %218 = vperm.xlu0 %641, %v212_v2   ;;  %s748_s27 = scalar_lea.vmem %s817_s0, %s630_s20  ;;  %s631_s7 = smul.u32 96, %s822_s13 }
   0xf   : > { %228 = vperm.xlu1 %642, %v214_v3   ;;  %v643_v6 = vld [vmem:[%s748_s27 + $0xac] ss:$12 sps:$4 sm:$0xff]   ;;  %v645_v7 = vld [vmem:[%s748_s27 + $0xb0] ss:$12 sps:$4 sm:$0xff]   ;;  %v646_v8 = vld [vmem:[%s748_s27 + $0xa8] ss:$12 sps:$4 sm:$0xff]  }
  0x10   : > { %405 = vmatprep.subr.bf16.mxu0 %v643_v6  ;;  %459 = vmatpush1.bf16.msra.mxu1 %v645_v7  ;;  %v647_v9 = vld [vmem:[%s748_s27 + $0x94] ss:$12 sps:$4 sm:$0xff]   ;;  %v649_v10 = vld [vmem:[%s748_s27 + $0x98] ss:$12 sps:$4 sm:$0xff]   ;;  %v650_v11 = vld [vmem:[%s748_s27 + $0x90] ss:$12 sps:$4 sm:$0xff]   ;;  %s800_s10 = scalar_lea.vmem %s820_s3, %s631_s7 }
  0x11   : > { %406 = vmatpush1.bf16.msra.mxu0 %v646_v8  ;;  %460 = vmatprep.subr.bf16.mxu1 %v693_v0  ;;  %v651_v12 = vld [vmem:[%s748_s27 + $0x7c] ss:$12 sps:$4 sm:$0xff]   ;;  %v653_v13 = vld [vmem:[%s748_s27 + $0x80] ss:$12 sps:$4 sm:$0xff]   ;;  %v654_v14 = vld [vmem:[%s748_s27 + $0x78] ss:$12 sps:$4 sm:$0xff]  }
  0x12   : > { %223 = vperm.xlu0 %641, %v213_v4   ;;  %407 = vmatprep.subr.bf16.mxu0 %v647_v9  ;;  %v655_v15 = vld [vmem:[%s748_s27 + $0x64] ss:$12 sps:$4 sm:$0xff]   ;;  %v657_v16 = vld [vmem:[%s748_s27 + $0x68] ss:$12 sps:$4 sm:$0xff]   ;;  %v658_v17 = vld [vmem:[%s748_s27 + $0x60] ss:$12 sps:$4 sm:$0xff]  }
  0x13   : > { %233 = vperm.xlu1 %642, %v215_v5   ;;  %v659_v18 = vld [vmem:[%s748_s27 + $0x4c] ss:$12 sps:$4 sm:$0xff]   ;;  %v661_v19 = vld [vmem:[%s748_s27 + $0x50] ss:$12 sps:$4 sm:$0xff]   ;;  %v662_v20 = vld [vmem:[%s748_s27 + $0x48] ss:$12 sps:$4 sm:$0xff]  }
  0x14   : > { %461 = vmatpush1.bf16.msra.mxu1 %v649_v10  ;;  %v663_v21 = vld [vmem:[%s748_s27 + $0x34] ss:$12 sps:$4 sm:$0xff]   ;;  %v665_v22 = vld [vmem:[%s748_s27 + $0x38] ss:$12 sps:$4 sm:$0xff]   ;;  %v666_v23 = vld [vmem:[%s748_s27 + $0x30] ss:$12 sps:$4 sm:$0xff]  }
  0x15   : > { %408 = vmatpush1.bf16.msra.mxu0 %v650_v11  ;;  %462 = vmatprep.subr.bf16.mxu1 %v693_v0  ;;  %v667_v24 = vld [vmem:[%s748_s27 + $0x1c] ss:$12 sps:$4 sm:$0xff]   ;;  %v669_v25 = vld [vmem:[%s748_s27 + $0x20] ss:$12 sps:$4 sm:$0xff]   ;;  %v670_v26 = vld [vmem:[%s748_s27 + $0x18] ss:$12 sps:$4 sm:$0xff]  }
  0x16   : > { %409 = vmatprep.subr.bf16.mxu0 %v651_v12  ;;  %v671_v27 = vld [vmem:[%s748_s27 + $0x4] ss:$12 sps:$4 sm:$0xff]   ;;  %v673_v28 = vld [vmem:[%s748_s27 + $0x8] ss:$12 sps:$4 sm:$0xff]   ;;  %v674_v29 = vld [vmem:[%s748_s27] ss:$12 sps:$4 sm:$0xff]  }
  0x17   : > { %v675_v30 = vld [vmem:[%s748_s27 + $0xc4] ss:$12 sps:$4 sm:$0xff]   ;;  %v677_v31 = vld [vmem:[%s748_s27 + $0xc8] ss:$12 sps:$4 sm:$0xff]   ;;  %v678_v32 = vld [vmem:[%s748_s27 + $0xc0] ss:$12 sps:$4 sm:$0xff]  }
  0x18   : > { %463 = vmatpush1.bf16.msra.mxu1 %v653_v13 }
  0x19   : > { %410 = vmatpush1.bf16.msra.mxu0 %v654_v14  ;;  %464 = vmatprep.subr.bf16.mxu1 %v693_v0 }
  0x1a   : > { %411 = vmatprep.subr.bf16.mxu0 %v655_v15 }
  0x1c   : > { %465 = vmatpush1.bf16.msra.mxu1 %v657_v16 }
  0x1d   : > { %412 = vmatpush1.bf16.msra.mxu0 %v658_v17  ;;  %466 = vmatprep.subr.bf16.mxu1 %v693_v0 }
  0x1e   : > { %413 = vmatprep.subr.bf16.mxu0 %v659_v18 }
  0x20   : > { %467 = vmatpush1.bf16.msra.mxu1 %v661_v19 }
  0x21   : > { %414 = vmatpush1.bf16.msra.mxu0 %v662_v20  ;;  %468 = vmatprep.subr.bf16.mxu1 %v693_v0 }
  0x22   : > { %415 = vmatprep.subr.bf16.mxu0 %v663_v21 }
  0x24   : > { %469 = vmatpush1.bf16.msra.mxu1 %v665_v22 }
  0x25   : > { %416 = vmatpush1.bf16.msra.mxu0 %v666_v23  ;;  %470 = vmatprep.subr.bf16.mxu1 %v693_v0 }
  0x26   : > { %417 = vmatprep.subr.bf16.mxu0 %v667_v24 }
  0x28   : > { %471 = vmatpush1.bf16.msra.mxu1 %v669_v25 }
  0x29   : > { %418 = vmatpush1.bf16.msra.mxu0 %v670_v26  ;;  %472 = vmatprep.subr.bf16.mxu1 %v693_v0 }
  0x2a   : > { %419 = vmatprep.subr.bf16.mxu0 %v671_v27 }
  0x2c   : > { %473 = vmatpush1.bf16.msra.mxu1 %v673_v28 }
  0x2d   : > { %420 = vmatpush1.bf16.msra.mxu0 %v674_v29  ;;  %488 = vmatprep.subr.bf16.mxu1 %v693_v0 }
  0x2e   : > { %435 = vmatprep.subr.bf16.mxu0 %v675_v30 }
  0x30   : > { %489 = vmatpush2.bf16.msra.mxu1 %v677_v31 }
  0x31   : > { %436 = vmatpush2.bf16.msra.mxu0 %v678_v32 }
  0x33   : > { %491 = vmatmul.mubr.bf16.vlgmr.msra.gmra.mxu1 %v679_v33 }
  0x34   : > { %438 = vmatmul.mubr.bf16.vlgmr.msra.gmra.mxu0 %v679_v33  ;;  %627 = vmatprep.mubr.msk.bf16.mxu1 %vm398_vm0, %v682_v34 }
  0x35   : > { %625 = vmatprep.mubr.msk.bf16.mxu0 %vm398_vm0, %v682_v34 }
  0x3b   : > { %499 = vmatmul.mubr.bf16.gmra.mxu1 %v684_v35 }
  0x3c   : > { %448 = vmatmul.mubr.bf16.gmra.mxu0 %v684_v35 }
  0x89   : > { %v219_v36 = vpop.permute.xlu0 %218 }
  0x8a   : > { %v229_v48 = vpop.permute.xlu1 %228 }
  0x8d   : > { %v224_v42 = vpop.permute.xlu0 %223 }
  0x8e   : > { %v234_v0 = vpop.permute.xlu1 %233 }
  0xf3   : > { %v492_v37 = vpop.f32.mrf.mxu1 }
  0xf4   : > { %v493_v38 = vadd.f32 %v492_v37, %v219_v36  ;;  %v439_v39 = vpop.f32.mrf.mxu0 }
  0xf5   : > { %v440_v40 = vadd.f32 %v439_v39, %v219_v36  ;;  %v494_v41 = vpop.f32.mrf.mxu1 }
  0xf6   : > { %v509_v43 = vmax.f32 %v493_v38, 0.0  ;;  %v441_v44 = vpop.f32.mrf.mxu0 }
  0xf7   : > { %v507_v45 = vmax.f32 %v440_v40, 0.0  ;;  %v442_v46 = vadd.f32 %v441_v44, %v219_v36  ;;  %v495_v47 = vpop.f32.mrf.mxu1 }
  0xf8   : > { %521 = vst [vmem:[%s800_s10 + $0x10] sm:$0xff] %v509_v43  ;;  %v496_v49 = vadd.f32 %v495_v47, %v224_v42  ;;  %v443_v50 = vpop.f32.mrf.mxu0 }
  0xf9   : > { %519 = vst [vmem:[%s800_s10] sm:$0xff] %v507_v45  ;;  %v508_v51 = vmax.f32 %v442_v46, 0.0  ;;  %v444_v52 = vadd.f32 %v443_v50, %v224_v42  ;;  %v497_v53 = vpop.f32.mrf.mxu1 }
  0xfa   : > { %v512_v54 = vmax.f32 %v496_v49, 0.0  ;;  %v445_v55 = vpop.f32.mrf.mxu0 }
  0xfb   : > { %520 = vst [vmem:[%s800_s10 + $0x8] sm:$0xff] %v508_v51  ;;  %v510_v56 = vmax.f32 %v444_v52, 0.0  ;;  %v446_v57 = vadd.f32 %v445_v55, %v224_v42  ;;  %v500_v58 = vpop.f32.mrf.mxu1 }
  0xfc   : > { %524 = vst [vmem:[%s800_s10 + $0x28] sm:$0xff] %v512_v54  ;;  %v501_v59 = vadd.f32 %v500_v58, %v229_v48  ;;  %v449_v60 = vpop.f32.mrf.mxu0 }
  0xfd   : > { %522 = vst [vmem:[%s800_s10 + $0x18] sm:$0xff] %v510_v56  ;;  %v511_v61 = vmax.f32 %v446_v57, 0.0  ;;  %v450_v62 = vadd.f32 %v449_v60, %v229_v48  ;;  %v502_v63 = vpop.f32.mrf.mxu1 }
  0xfe   : > { %v515_v1 = vmax.f32 %v501_v59, 0.0  ;;  %v451_v2 = vpop.f32.mrf.mxu0 }
  0xff   : > { %523 = vst [vmem:[%s800_s10 + $0x20] sm:$0xff] %v511_v61  ;;  %v513_v3 = vmax.f32 %v450_v62, 0.0  ;;  %v452_v4 = vadd.f32 %v451_v2, %v229_v48  ;;  %v503_v5 = vpop.f32.mrf.mxu1 }
 0x100   : > { %527 = vst [vmem:[%s800_s10 + $0x40] sm:$0xff] %v515_v1  ;;  %v504_v6 = vadd.f32 %v503_v5, %v234_v0  ;;  %v453_v7 = vpop.f32.mrf.mxu0 }
 0x101   : > { %525 = vst [vmem:[%s800_s10 + $0x30] sm:$0xff] %v513_v3  ;;  %v514_v8 = vmax.f32 %v452_v4, 0.0  ;;  %v454_v9 = vadd.f32 %v453_v7, %v234_v0  ;;  %v505_v10 = vpop.f32.mrf.mxu1 }
 0x102   : > { %v518_v11 = vmax.f32 %v504_v6, 0.0  ;;  %v455_v12 = vpop.f32.mrf.mxu0 }
 0x103   : > { %526 = vst [vmem:[%s800_s10 + $0x38] sm:$0xff] %v514_v8  ;;  %v516_v13 = vmax.f32 %v454_v9, 0.0  ;;  %v456_v14 = vadd.f32 %v455_v12, %v234_v0 }
 0x104   : > { %530 = vst [vmem:[%s800_s10 + $0x58] sm:$0xff] %v518_v11 }
 0x105   : > { %528 = vst [vmem:[%s800_s10 + $0x48] sm:$0xff] %v516_v13  ;;  %v517_v15 = vmax.f32 %v456_v14, 0.0 }
 0x107   : > { %529 = vst [vmem:[%s800_s10 + $0x50] sm:$0xff] %v517_v15 }
 0x108 PF: > { %s13_s12 = sadd.s32 1, %s691_s12  }
 0x109   : > { %p10_p4 = scmp.ge.s32.totalorder %s13_s12, 4  }
 0x10b   :  { %12 = sbr.rel (!%p10_p4) target bundleno = 1 (0x1), region = 62 }

// kernel: dqn_forward.5
= control target key start
LH: loop header
LB: loop body
LE: loop exit
PB: predicated region body
PF: predicated region fallthrough
CT: control target
= control target key end

     0   :  { %10 = vsyncpa [#allocation4], 0  ;;  %s3775_s18 = smov 0   ;;  %s4089_s0 = inlined_call_operand.vmem [shape: bf16[2,10368], index: 0, kind: input, shape index: {}]   ;;  %s4090_s1 = inlined_call_operand.vmem [shape: bf16[10368,64], index: 1, kind: input, shape index: {}]   ;;  %s4091_s2 = inlined_call_operand.vmem [shape: f32[1,64], index: 2, kind: input, shape index: {}]   ;;  %s4092_s3 = inlined_call_operand.vmem [shape: bf16[64,6], index: 3, kind: input, shape index: {}]   ;;  %s4093_s4 = inlined_call_operand.vmem [shape: f32[1,6], index: 4, kind: input, shape index: {}]   ;;  %s4094_s5 = inlined_call_operand.hbm [shape: f32[2,6], index: 5, kind: output, shape index: {}]  }
   0x1 LB: > { %s3781_s19 = sadd.s32 4294967295, %s3736_s18   ;;  %p2894_p0 = scmp.ge.s32.totalorder %s3736_s18, 1  ;;  %s3736_s18 = sphi %s3775_s18, %s16_s18  }
   0x2   : > { %p194_p1 = scmp.lt.s32.totalorder %s3736_s18, 4 }
   0x4   : > { %p195_p2 = pnand %p2894_p0, %p194_p1 }
   0x5   : > { %s221_s20 = smul.u32 (!%p195_p2), 27, %s3781_s19  ;;  %p2896_p5 = scmp.ne.s32.totalorder (!%p195_p2), %s3781_s19, 0 }
   0x6   : > { %198 = sbr.rel (%p195_p2) target bundleno = 681 (0x2a9), region = 40 }
   0x7   : > { %s226_s21 = smul.u32 (!%p195_p2), 432, %s3781_s19  ;;  %p222_p3 = scmp.lt.s32.totalorder (!%p195_p2), %s221_s20, 80 }
   0x9   : > { %p227_p4 = scmp.lt.s32.totalorder (!%p195_p2), %s226_s21, 1295 }
   0xb   : > { %s4096_s20 = smov (!%p222_p3, %s221_s20), 80  ;;  %s4098_s21 = smov (!%p227_p4, %s226_s21), 1295 }
   0xc   : > { %s3790_s24 = scalar_lea.vmem %s4089_s0, %s4096_s20  ;;  %s2895_s25 = sshll.u32 %s4098_s21, 2 }
   0xd   : > { %s3795_s28 = scalar_lea.vmem %s4090_s1, %s2895_s25  ;;  %236 = sbr.rel (%p2896_p5) target bundleno = 20 (0x14), region = 44 }
  0x12   : > { %vm237_vm0 = vcmask 517120   ;;  %v3738_v0 = vmov 0.0  }
  0x13   : > { %238 = vst.msk [vmem:[#allocation2] sm:$0x3] %vm237_vm0, %v3738_v0 }
  0x14 PF: > { %v3479_v1 = vld [vmem:[%s3795_s28 + $0x78] sm:$0xff]   ;;  %v3483_v5 = vld [vmem:[%s3795_s28 + $0x70] sm:$0xff]   ;;  %v3487_v9 = vld [vmem:[%s3795_s28 + $0x68] sm:$0xff]   ;;  %v684_v29 = vlaneseq  ;;  %v3739_v37 = vmov 1966171168   ;;  %vm3741_vm1 = vmmov 0  }
  0x15   : > { %v3480_v2 = vld [vmem:[%s3795_s28 + $0xf8] sm:$0xff]   ;;  %3126 = vmatprep.subr.bf16.mxu0 %v3479_v1  ;;  %v3484_v6 = vld [vmem:[%s3795_s28 + $0xf0] sm:$0xff]   ;;  %v3488_v10 = vld [vmem:[%s3795_s28 + $0xe8] sm:$0xff]   ;;  %v682_v38 = vunpack.c.l.s4 %v3739_v37  ;;  %vm2734_vm2 = vcmask 517120   ;;  %p3114_p6 = scmp.ne.s32.totalorder %s3781_s19, 2 }
  0x16   : > { %v3481_v3 = vld [vmem:[%s3795_s28 + $0x38] sm:$0xff]   ;;  %3148 = vmatprep.subr.bf16.mxu1 %v3480_v2  ;;  %v3485_v7 = vld [vmem:[%s3795_s28 + $0x30] sm:$0xff]   ;;  %v3489_v11 = vld [vmem:[%s3795_s28 + $0x28] sm:$0xff]   ;;  %v685_v34 = vshrl.u32 %v684_v29, 7 }
  0x17   : > { %v3482_v4 = vld [vmem:[%s3795_s28 + $0xb8] sm:$0xff]   ;;  %3127 = vmatpush3.bf16.msra.mxu0 %v3481_v3  ;;  %v3486_v8 = vld [vmem:[%s3795_s28 + $0xb0] sm:$0xff]   ;;  %v3490_v12 = vld [vmem:[%s3795_s28 + $0xa8] sm:$0xff]   ;;  %v683_v41 = vunpack.c.0.s8 %v682_v38 }
  0x18   : > { %3149 = vmatpush3.bf16.msra.mxu1 %v3482_v4  ;;  %3128 = vmatprep.subr.bf16.mxu0 %v3483_v5  ;;  %v3491_v13 = vld [vmem:[%s3795_s28 + $0x60] sm:$0xff]   ;;  %v3495_v17 = vld [vmem:[%s3795_s28 + $0x58] sm:$0xff]   ;;  %v3499_v21 = vld [vmem:[%s3795_s28 + $0x50] sm:$0xff]  }
  0x19   : > { %3150 = vmatprep.subr.bf16.mxu1 %v3484_v6  ;;  %v3492_v14 = vld [vmem:[%s3795_s28 + $0xe0] sm:$0xff]   ;;  %v3496_v18 = vld [vmem:[%s3795_s28 + $0xd8] sm:$0xff]   ;;  %v3500_v22 = vld [vmem:[%s3795_s28 + $0xd0] sm:$0xff]   ;;  %v3833_v42 = vsub.s32 %v683_v41, %v685_v34 }
  0x1a   : > { %v3493_v15 = vld [vmem:[%s3795_s28 + $0x20] sm:$0xff]   ;;  %v3497_v19 = vld [vmem:[%s3795_s28 + $0x18] sm:$0xff]   ;;  %v3501_v23 = vld [vmem:[%s3795_s28 + $0x10] sm:$0xff]  }
  0x1b   : > { %3129 = vmatpush3.bf16.msra.mxu0 %v3485_v7  ;;  %v3494_v16 = vld [vmem:[%s3795_s28 + $0xa0] sm:$0xff]   ;;  %v3498_v20 = vld [vmem:[%s3795_s28 + $0x98] sm:$0xff]   ;;  %v3502_v24 = vld [vmem:[%s3795_s28 + $0x90] sm:$0xff]  }
  0x1c   : > { %3151 = vmatpush3.bf16.msra.mxu1 %v3486_v8  ;;  %3130 = vmatprep.subr.bf16.mxu0 %v3487_v9  ;;  %v3503_v25 = vld [vmem:[%s3795_s28 + $0x48] sm:$0xff]   ;;  %v3507_v30 = vld [vmem:[%s3795_s28 + $0x40] sm:$0xff]   ;;  %v3512_v36 = vld [vmem:[%s3795_s28 + $0x178] sm:$0xff]  }
  0x1d   : > { %3152 = vmatprep.subr.bf16.mxu1 %v3488_v10  ;;  %v3504_v26 = vld [vmem:[%s3795_s28 + $0xc8] sm:$0xff]   ;;  %v3508_v31 = vld [vmem:[%s3795_s28 + $0xc0] sm:$0xff]   ;;  %v3513_v39 = vld [vmem:[%s3795_s28 + $0x1f8] sm:$0xff]  }
  0x1e   : > { %v3505_v27 = vld [vmem:[%s3795_s28 + $0x8] sm:$0xff]   ;;  %v3509_v32 = vld [vmem:[%s3795_s28] sm:$0xff]   ;;  %v3514_v49 = vld [vmem:[%s3795_s28 + $0x138] sm:$0xff]  }
  0x1f   : > { %3131 = vmatpush3.bf16.msra.mxu0 %v3489_v11  ;;  %v3506_v28 = vld [vmem:[%s3795_s28 + $0x88] sm:$0xff]   ;;  %v3510_v33 = vld [vmem:[%s3795_s28 + $0x80] sm:$0xff]   ;;  %v3516_v52 = vld [vmem:[%s3795_s28 + $0x170] sm:$0xff]  }
  0x20   : > { %3153 = vmatpush3.bf16.msra.mxu1 %v3490_v12  ;;  %3132 = vmatprep.subr.bf16.mxu0 %v3491_v13  ;;  %v240_v35 = vld [vmem:[%s3790_s24] sm:$0xff]  ;;  %v3515_v54 = vld [vmem:[%s3795_s28 + $0x1b8] sm:$0xff]   ;;  %v3517_v55 = vld [vmem:[%s3795_s28 + $0x1f0] sm:$0xff]  }
  0x21   : > { %3154 = vmatprep.subr.bf16.mxu1 %v3492_v14  ;;  %v680_v40 = vcombine.high %v240_v35, %v240_v35  ;;  %v687_v43 = vrot.slane %v240_v35, %v3833_v42  ;;  %v3518_v57 = vld [vmem:[%s3795_s28 + $0x130] sm:$0xff]   ;;  %v3520_v58 = vld [vmem:[%s3795_s28 + $0x168] sm:$0xff]   ;;  %v3524_v62 = vld [vmem:[%s3795_s28 + $0x160] sm:$0xff]  }
  0x22   : > { %v3519_v59 = vld [vmem:[%s3795_s28 + $0x1b0] sm:$0xff]   ;;  %v3521_v60 = vld [vmem:[%s3795_s28 + $0x1e8] sm:$0xff]   ;;  %v3525_v0 = vld [vmem:[%s3795_s28 + $0x1e0] sm:$0xff]  }
  0x23   : > { %3133 = vmatpush3.bf16.msra.mxu0 %v3493_v15  ;;  %v3837_v44 = vrot.slane %v680_v40, %v3833_v42  ;;  %v695_v45 = vcombine.high %v687_v43, %v687_v43  ;;  %v703_v46 = vrot.slane %v687_v43, %v3833_v42  ;;  %v3522_v61 = vld [vmem:[%s3795_s28 + $0x128] sm:$0xff]   ;;  %v3526_v1 = vld [vmem:[%s3795_s28 + $0x120] sm:$0xff]   ;;  %v3528_v2 = vld [vmem:[%s3795_s28 + $0x158] sm:$0xff]  }
  0x24   : > { %3155 = vmatpush3.bf16.msra.mxu1 %v3494_v16  ;;  %3134 = vmatprep.subr.bf16.mxu0 %v3495_v17  ;;  %v3523_v63 = vld [vmem:[%s3795_s28 + $0x1a8] sm:$0xff]   ;;  %v3527_v3 = vld [vmem:[%s3795_s28 + $0x1a0] sm:$0xff]   ;;  %v3529_v4 = vld [vmem:[%s3795_s28 + $0x1d8] sm:$0xff]  }
  0x25   : > { %3156 = vmatprep.subr.bf16.mxu1 %v3496_v18  ;;  %v696_v47 = vcombine.high %v3837_v44, %v3837_v44  ;;  %v717_v48 = vrot.slane %v695_v45, %v3833_v42  ;;  %v725_v51 = vcombine.high %v703_v46, %v703_v46  ;;  %v3530_v5 = vld [vmem:[%s3795_s28 + $0x118] sm:$0xff]   ;;  %v3532_v6 = vld [vmem:[%s3795_s28 + $0x150] sm:$0xff]   ;;  %v3536_v10 = vld [vmem:[%s3795_s28 + $0x148] sm:$0xff]   ;;  %v710_v18 = vrot.slane %v3837_v44, %v3833_v42 }
  0x26   : > { %v3531_v7 = vld [vmem:[%s3795_s28 + $0x198] sm:$0xff]   ;;  %v3533_v8 = vld [vmem:[%s3795_s28 + $0x1d0] sm:$0xff]   ;;  %v3537_v12 = vld [vmem:[%s3795_s28 + $0x1c8] sm:$0xff]  }
  0x27   : > { %3135 = vmatpush3.bf16.msra.mxu0 %v3497_v19  ;;  %v724_v50 = vrot.slane %v696_v47, %v3833_v42  ;;  %2205 = vmatprep.mubr.bf16.mxu0 %v717_v48  ;;  %v727_v53 = vcombine.high %v717_v48, %v717_v48  ;;  %v3534_v9 = vld [vmem:[%s3795_s28 + $0x110] sm:$0xff]   ;;  %v3538_v13 = vld [vmem:[%s3795_s28 + $0x108] sm:$0xff]   ;;  %v3540_v14 = vld [vmem:[%s3795_s28 + $0x140] sm:$0xff]  }
  0x28   : > { %3157 = vmatpush3.bf16.msra.mxu1 %v3498_v20  ;;  %3136 = vmatprep.subr.bf16.mxu0 %v3499_v21  ;;  %v3535_v11 = vld [vmem:[%s3795_s28 + $0x190] sm:$0xff]   ;;  %v3539_v15 = vld [vmem:[%s3795_s28 + $0x188] sm:$0xff]   ;;  %v3541_v16 = vld [vmem:[%s3795_s28 + $0x1c0] sm:$0xff]  }
  0x29   : > { %3158 = vmatprep.subr.bf16.mxu1 %v3500_v22  ;;  %v728_v56 = vcombine.high %v724_v50, %v724_v50  ;;  %2245 = vmatprep.mubr.bf16.mxu1 %v727_v53  ;;  %v3542_v17 = vld [vmem:[%s3795_s28 + $0x100] sm:$0xff]   ;;  %v3544_v19 = vld [vmem:[%s3795_s28 + $0x278] sm:$0xff]   ;;  %v3551_v29 = vld [vmem:[%s3795_s28 + $0x2b0] sm:$0xff]  }
  0x2a   : > { %v3543_v20 = vld [vmem:[%s3795_s28 + $0x180] sm:$0xff]   ;;  %v3545_v21 = vld [vmem:[%s3795_s28 + $0x2f8] sm:$0xff]   ;;  %v3564_v40 = vld [vmem:[%s3795_s28 + $0x250] sm:$0xff]  }
  0x2b   : > { %3137 = vmatpush3.bf16.msra.mxu0 %v3501_v23  ;;  %v3546_v22 = vld [vmem:[%s3795_s28 + $0x238] sm:$0xff]   ;;  %v726_v23 = vcombine.high %v710_v18, %v710_v18  ;;  %v3557_v34 = vld [vmem:[%s3795_s28 + $0x2e0] sm:$0xff]   ;;  %v3565_v43 = vld [vmem:[%s3795_s28 + $0x2d0] sm:$0xff]  }
  0x2c   : > { %3159 = vmatpush3.bf16.msra.mxu1 %v3502_v24  ;;  %3138 = vmatprep.subr.bf16.mxu0 %v3503_v25  ;;  %v3548_v24 = vld [vmem:[%s3795_s28 + $0x270] sm:$0xff]   ;;  %v3547_v25 = vld [vmem:[%s3795_s28 + $0x2b8] sm:$0xff]   ;;  %v3558_v35 = vld [vmem:[%s3795_s28 + $0x220] sm:$0xff]  }
  0x2d   : > { %3160 = vmatprep.subr.bf16.mxu1 %v3504_v26  ;;  %v3549_v26 = vld [vmem:[%s3795_s28 + $0x2f0] sm:$0xff]   ;;  %v3559_v37 = vld [vmem:[%s3795_s28 + $0x2a0] sm:$0xff]   ;;  %v3561_v38 = vld [vmem:[%s3795_s28 + $0x2d8] sm:$0xff]  }
  0x2e   : > { %v3563_v41 = vld [vmem:[%s3795_s28 + $0x298] sm:$0xff]   ;;  %v3566_v44 = vld [vmem:[%s3795_s28 + $0x210] sm:$0xff]   ;;  %v3568_v45 = vld [vmem:[%s3795_s28 + $0x248] sm:$0xff]  }
  0x2f   : > { %3139 = vmatpush3.bf16.msra.mxu0 %v3505_v27  ;;  %v3550_v27 = vld [vmem:[%s3795_s28 + $0x230] sm:$0xff]  }
  0x30   : > { %3161 = vmatpush3.bf16.msra.mxu1 %v3506_v28  ;;  %3140 = vmatprep.subr.bf16.mxu0 %v3507_v30  ;;  %v3552_v28 = vld [vmem:[%s3795_s28 + $0x268] sm:$0xff]   ;;  %v3567_v47 = vld [vmem:[%s3795_s28 + $0x290] sm:$0xff]  }
  0x31   : > { %3162 = vmatprep.subr.bf16.mxu1 %v3508_v31  ;;  %v3553_v30 = vld [vmem:[%s3795_s28 + $0x2e8] sm:$0xff]  }
  0x32   : > { %v3554_v31 = vld [vmem:[%s3795_s28 + $0x228] sm:$0xff]  }
  0x33   : > { %3141 = vmatpush3.bf16.msra.mxu0 %v3509_v32  ;;  %v3556_v32 = vld [vmem:[%s3795_s28 + $0x260] sm:$0xff]  }
  0x34   : > { %3163 = vmatpush3.bf16.msra.mxu1 %v3510_v33  ;;  %3170 = vmatprep.subr.bf16.mxu0 %v3512_v36  ;;  %v3555_v33 = vld [vmem:[%s3795_s28 + $0x2a8] sm:$0xff]   ;;  %v3560_v36 = vld [vmem:[%s3795_s28 + $0x258] sm:$0xff]  }
  0x35   : > { %3192 = vmatprep.subr.bf16.mxu1 %v3513_v39  ;;  %v3562_v39 = vld [vmem:[%s3795_s28 + $0x218] sm:$0xff]  }
  0x36   : > { %2206 = vmatmul.mubr.bf16.vlgmr.msra.gmra.mxu0 %v703_v46  ;;  %v241_v46 = vld [vmem:[%s3790_s24 + $0x8] sm:$0xff] }
  0x37   : > { %3171 = vmatpush3.bf16.msra.mxu0 %v3514_v49  ;;  %2246 = vmatmul.mubr.bf16.vlgmr.msra.gmra.mxu1 %v725_v51  ;;  %v736_v48 = vrot.slane %v241_v46, %v3833_v42  ;;  %v729_v49 = vcombine.high %v241_v46, %v241_v46  ;;  %v3570_v51 = vld [vmem:[%s3795_s28 + $0x208] sm:$0xff]  }
  0x38   : > { %3172 = vmatprep.subr.bf16.mxu0 %v3516_v52  ;;  %3193 = vmatpush3.bf16.msra.mxu1 %v3515_v54  ;;  %v3572_v54 = vld [vmem:[%s3795_s28 + $0x240] sm:$0xff]   ;;  %v3618_v46 = vld [vmem:[%s3795_s28 + $0x4e8] sm:$0xff]  }
  0x39   : > { %2285 = vmatprep.mubr.bf16.mxu0 %v724_v50  ;;  %3194 = vmatprep.subr.bf16.mxu1 %v3517_v55  ;;  %v3569_v50 = vld [vmem:[%s3795_s28 + $0x2c8] sm:$0xff]   ;;  %v744_v52 = vcombine.high %v736_v48, %v736_v48  ;;  %v3906_v53 = vrot.slane %v729_v49, %v3833_v42 }
  0x3a   : > { %2325 = vmatprep.mubr.bf16.mxu1 %v728_v56  ;;  %v3571_v55 = vld [vmem:[%s3795_s28 + $0x288] sm:$0xff]  }
  0x3b   : > { %3173 = vmatpush3.bf16.msra.mxu0 %v3518_v57  ;;  %v766_v56 = vrot.slane %v744_v52, %v3833_v42  ;;  %v745_v57 = vcombine.high %v3906_v53, %v3906_v53  ;;  %v3620_v49 = vld [vmem:[%s3795_s28 + $0x4a8] sm:$0xff]   ;;  %v3625_v52 = vld [vmem:[%s3795_s28 + $0x458] sm:$0xff]  }
  0x3c   : > { %3174 = vmatprep.subr.bf16.mxu0 %v3520_v58  ;;  %3195 = vmatpush3.bf16.msra.mxu1 %v3519_v59  ;;  %v3573_v58 = vld [vmem:[%s3795_s28 + $0x2c0] sm:$0xff]  }
  0x3d   : > { %3196 = vmatprep.subr.bf16.mxu1 %v3521_v60  ;;  %v3574_v59 = vld [vmem:[%s3795_s28 + $0x200] sm:$0xff]   ;;  %v776_v60 = vcombine.high %v766_v56, %v766_v56 }
  0x3f   : > { %3175 = vmatpush3.bf16.msra.mxu0 %v3522_v61  ;;  %v752_v61 = vrot.slane %v736_v48, %v3833_v42  ;;  %v3621_v48 = vld [vmem:[%s3795_s28 + $0x460] sm:$0xff]  }
  0x40   : > { %3176 = vmatprep.subr.bf16.mxu0 %v3524_v62  ;;  %3197 = vmatpush3.bf16.msra.mxu1 %v3523_v63  ;;  %v3576_v62 = vld [vmem:[%s3795_s28 + $0x378] sm:$0xff]   ;;  %v3575_v63 = vld [vmem:[%s3795_s28 + $0x280] sm:$0xff]  }
  0x41   : > { %3198 = vmatprep.subr.bf16.mxu1 %v3525_v0  ;;  %v773_v0 = vrot.slane %v745_v57, %v3833_v42  ;;  %v3628_v57 = vld [vmem:[%s3795_s28 + $0x498] sm:$0xff]  }
  0x43   : > { %3177 = vmatpush3.bf16.msra.mxu0 %v3526_v1  ;;  %v3577_v1 = vld [vmem:[%s3795_s28 + $0x3f8] sm:$0xff]  }
  0x44   : > { %3178 = vmatprep.subr.bf16.mxu0 %v3528_v2  ;;  %3199 = vmatpush3.bf16.msra.mxu1 %v3527_v3  ;;  %v3578_v2 = vld [vmem:[%s3795_s28 + $0x338] sm:$0xff]   ;;  %v774_v3 = vcombine.high %v752_v61, %v752_v61 }
  0x45   : > { %3200 = vmatprep.subr.bf16.mxu1 %v3529_v4  ;;  %v3580_v4 = vld [vmem:[%s3795_s28 + $0x370] sm:$0xff]  }
  0x47   : > { %3179 = vmatpush3.bf16.msra.mxu0 %v3530_v5  ;;  %v3579_v5 = vld [vmem:[%s3795_s28 + $0x3b8] sm:$0xff]  }
  0x48   : > { %3180 = vmatprep.subr.bf16.mxu0 %v3532_v6  ;;  %3201 = vmatpush3.bf16.msra.mxu1 %v3531_v7  ;;  %v777_v6 = vcombine.high %v773_v0, %v773_v0  ;;  %v3581_v7 = vld [vmem:[%s3795_s28 + $0x3f0] sm:$0xff]  }
  0x49   : > { %3202 = vmatprep.subr.bf16.mxu1 %v3533_v8  ;;  %v3582_v8 = vld [vmem:[%s3795_s28 + $0x330] sm:$0xff]  }
  0x4b   : > { %3181 = vmatpush3.bf16.msra.mxu0 %v3534_v9  ;;  %v3584_v9 = vld [vmem:[%s3795_s28 + $0x368] sm:$0xff]  }
  0x4c   : > { %3182 = vmatprep.subr.bf16.mxu0 %v3536_v10  ;;  %3203 = vmatpush3.bf16.msra.mxu1 %v3535_v11  ;;  %v3583_v10 = vld [vmem:[%s3795_s28 + $0x3b0] sm:$0xff]   ;;  %v3585_v11 = vld [vmem:[%s3795_s28 + $0x3e8] sm:$0xff]  }
  0x4d   : > { %3204 = vmatprep.subr.bf16.mxu1 %v3537_v12  ;;  %v3586_v12 = vld [vmem:[%s3795_s28 + $0x328] sm:$0xff]  }
  0x4f   : > { %3183 = vmatpush3.bf16.msra.mxu0 %v3538_v13  ;;  %v3588_v13 = vld [vmem:[%s3795_s28 + $0x360] sm:$0xff]  }
  0x50   : > { %3184 = vmatprep.subr.bf16.mxu0 %v3540_v14  ;;  %3205 = vmatpush3.bf16.msra.mxu1 %v3539_v15  ;;  %v3587_v14 = vld [vmem:[%s3795_s28 + $0x3a8] sm:$0xff]   ;;  %v3589_v15 = vld [vmem:[%s3795_s28 + $0x3e0] sm:$0xff]  }
  0x51   : > { %3206 = vmatprep.subr.bf16.mxu1 %v3541_v16  ;;  %v3590_v16 = vld [vmem:[%s3795_s28 + $0x320] sm:$0xff]  }
  0x53   : > { %3185 = vmatpush3.bf16.msra.mxu0 %v3542_v17  ;;  %v3592_v17 = vld [vmem:[%s3795_s28 + $0x358] sm:$0xff]  }
  0x54   : > { %3214 = vmatprep.subr.bf16.mxu0 %v3544_v19  ;;  %3207 = vmatpush3.bf16.msra.mxu1 %v3543_v20  ;;  %v3593_v19 = vld [vmem:[%s3795_s28 + $0x3d8] sm:$0xff]  }
  0x55   : > { %3236 = vmatprep.subr.bf16.mxu1 %v3545_v21  ;;  %v3594_v20 = vld [vmem:[%s3795_s28 + $0x318] sm:$0xff]   ;;  %v3596_v21 = vld [vmem:[%s3795_s28 + $0x350] sm:$0xff]  }
  0x56   : > { %2286 = vmatmul.mubr.bf16.vlgmr.msra.gmra.mxu0 %v710_v18  ;;  %v3591_v18 = vld [vmem:[%s3795_s28 + $0x3a0] sm:$0xff]  }
  0x57   : > { %3215 = vmatpush3.bf16.msra.mxu0 %v3546_v22  ;;  %2326 = vmatmul.mubr.bf16.vlgmr.msra.gmra.mxu1 %v726_v23  ;;  %v3595_v22 = vld [vmem:[%s3795_s28 + $0x398] sm:$0xff]   ;;  %v3597_v23 = vld [vmem:[%s3795_s28 + $0x3d0] sm:$0xff]  }
  0x58   : > { %3216 = vmatprep.subr.bf16.mxu0 %v3548_v24  ;;  %3237 = vmatpush3.bf16.msra.mxu1 %v3547_v25  ;;  %v3598_v24 = vld [vmem:[%s3795_s28 + $0x310] sm:$0xff]   ;;  %v3600_v25 = vld [vmem:[%s3795_s28 + $0x348] sm:$0xff]  }
  0x59   : > { %3238 = vmatprep.subr.bf16.mxu1 %v3549_v26  ;;  %2365 = vmatprep.mubr.bf16.mxu0 %v766_v56  ;;  %v3599_v26 = vld [vmem:[%s3795_s28 + $0x390] sm:$0xff]  }
  0x5a   : > { %2405 = vmatprep.mubr.bf16.mxu1 %v776_v60  ;;  %v3629_v56 = vld [vmem:[%s3795_s28 + $0x450] sm:$0xff]   ;;  %v3633_v60 = vld [vmem:[%s3795_s28 + $0x448] sm:$0xff]  }
  0x5b   : > { %3217 = vmatpush3.bf16.msra.mxu0 %v3550_v27  ;;  %v3601_v27 = vld [vmem:[%s3795_s28 + $0x3c8] sm:$0xff]  }
  0x5c   : > { %3218 = vmatprep.subr.bf16.mxu0 %v3552_v28  ;;  %3239 = vmatpush3.bf16.msra.mxu1 %v3551_v29  ;;  %v3602_v28 = vld [vmem:[%s3795_s28 + $0x308] sm:$0xff]   ;;  %v3604_v29 = vld [vmem:[%s3795_s28 + $0x340] sm:$0xff]  }
  0x5d   : > { %3240 = vmatprep.subr.bf16.mxu1 %v3553_v30  ;;  %v3603_v30 = vld [vmem:[%s3795_s28 + $0x388] sm:$0xff]  }
  0x5f   : > { %3219 = vmatpush3.bf16.msra.mxu0 %v3554_v31  ;;  %v3605_v31 = vld [vmem:[%s3795_s28 + $0x3c0] sm:$0xff]  }
  0x60   : > { %3220 = vmatprep.subr.bf16.mxu0 %v3556_v32  ;;  %3241 = vmatpush3.bf16.msra.mxu1 %v3555_v33  ;;  %v3606_v32 = vld [vmem:[%s3795_s28 + $0x300] sm:$0xff]   ;;  %v759_v33 = vrot.slane %v3906_v53, %v3833_v42 }
  0x61   : > { %3242 = vmatprep.subr.bf16.mxu1 %v3557_v34  ;;  %v3609_v34 = vld [vmem:[%s3795_s28 + $0x478] sm:$0xff]   ;;  %v3624_v53 = vld [vmem:[%s3795_s28 + $0x4a0] sm:$0xff]  }
  0x63   : > { %3221 = vmatpush3.bf16.msra.mxu0 %v3558_v35  ;;  %v3607_v35 = vld [vmem:[%s3795_s28 + $0x380] sm:$0xff]  }
  0x64   : > { %3222 = vmatprep.subr.bf16.mxu0 %v3560_v36  ;;  %3243 = vmatpush3.bf16.msra.mxu1 %v3559_v37  ;;  %v3610_v36 = vld [vmem:[%s3795_s28 + $0x4f8] sm:$0xff]  }
  0x65   : > { %3244 = vmatprep.subr.bf16.mxu1 %v3561_v38  ;;  %v3611_v37 = vld [vmem:[%s3795_s28 + $0x438] sm:$0xff]   ;;  %v775_v38 = vcombine.high %v759_v33, %v759_v33 }
  0x67   : > { %3223 = vmatpush3.bf16.msra.mxu0 %v3562_v39  ;;  %v3613_v39 = vld [vmem:[%s3795_s28 + $0x470] sm:$0xff]  }
  0x68   : > { %3224 = vmatprep.subr.bf16.mxu0 %v3564_v40  ;;  %3245 = vmatpush3.bf16.msra.mxu1 %v3563_v41  ;;  %v3612_v40 = vld [vmem:[%s3795_s28 + $0x4b8] sm:$0xff]   ;;  %v3614_v41 = vld [vmem:[%s3795_s28 + $0x4f0] sm:$0xff]  }
  0x69   : > { %3246 = vmatprep.subr.bf16.mxu1 %v3565_v43  ;;  %v3615_v43 = vld [vmem:[%s3795_s28 + $0x430] sm:$0xff]  }
  0x6b   : > { %3225 = vmatpush3.bf16.msra.mxu0 %v3566_v44  ;;  %v3617_v44 = vld [vmem:[%s3795_s28 + $0x468] sm:$0xff]  }
  0x6c   : > { %3226 = vmatprep.subr.bf16.mxu0 %v3568_v45  ;;  %3247 = vmatpush3.bf16.msra.mxu1 %v3567_v47  ;;  %v3616_v45 = vld [vmem:[%s3795_s28 + $0x4b0] sm:$0xff]   ;;  %v3619_v47 = vld [vmem:[%s3795_s28 + $0x428] sm:$0xff]  }
  0x6d   : > { %3248 = vmatprep.subr.bf16.mxu1 %v3569_v50  ;;  %v3622_v50 = vld [vmem:[%s3795_s28 + $0x4e0] sm:$0xff]  }
  0x6f   : > { %3227 = vmatpush3.bf16.msra.mxu0 %v3570_v51  ;;  %v3623_v51 = vld [vmem:[%s3795_s28 + $0x420] sm:$0xff]  }
  0x70   : > { %3228 = vmatprep.subr.bf16.mxu0 %v3572_v54  ;;  %3249 = vmatpush3.bf16.msra.mxu1 %v3571_v55  ;;  %v3626_v54 = vld [vmem:[%s3795_s28 + $0x4d8] sm:$0xff]  }
  0x71   : > { %3250 = vmatprep.subr.bf16.mxu1 %v3573_v58  ;;  %v3627_v55 = vld [vmem:[%s3795_s28 + $0x418] sm:$0xff]   ;;  %v3630_v58 = vld [vmem:[%s3795_s28 + $0x4d0] sm:$0xff]  }
  0x73   : > { %3229 = vmatpush3.bf16.msra.mxu0 %v3574_v59  ;;  %v3631_v59 = vld [vmem:[%s3795_s28 + $0x410] sm:$0xff]  }
  0x74   : > { %3258 = vmatprep.subr.bf16.mxu0 %v3576_v62  ;;  %3251 = vmatpush3.bf16.msra.mxu1 %v3575_v63  ;;  %v3632_v62 = vld [vmem:[%s3795_s28 + $0x490] sm:$0xff]  }
  0x75   : > { %3280 = vmatprep.subr.bf16.mxu1 %v3577_v1  ;;  %v3634_v1 = vld [vmem:[%s3795_s28 + $0x4c8] sm:$0xff]  }
  0x76   : > { %2366 = vmatmul.mubr.bf16.vlgmr.msra.gmra.mxu0 %v752_v61  ;;  %v242_v61 = vld [vmem:[%s3790_s24 + $0x10] sm:$0xff] }
  0x77   : > { %3259 = vmatpush3.bf16.msra.mxu0 %v3578_v2  ;;  %2445 = vmatprep.mubr.bf16.mxu0 %v773_v0  ;;  %v785_v63 = vrot.slane %v242_v61, %v3833_v42  ;;  %v778_v0 = vcombine.high %v242_v61, %v242_v61  ;;  %v3635_v2 = vld [vmem:[%s3795_s28 + $0x408] sm:$0xff]   ;;  %v3683_v61 = vld [vmem:[%s3795_s28 + $0x660] sm:$0xff]  }
  0x78   : > { %2406 = vmatmul.mubr.bf16.vlgmr.msra.gmra.mxu1 %v774_v3  ;;  %3260 = vmatprep.subr.bf16.mxu0 %v3580_v4 }
  0x79   : > { %3281 = vmatpush3.bf16.msra.mxu1 %v3579_v5  ;;  %2485 = vmatprep.mubr.bf16.mxu1 %v777_v6  ;;  %v793_v3 = vcombine.high %v785_v63, %v785_v63  ;;  %v3982_v4 = vrot.slane %v778_v0, %v3833_v42  ;;  %v3637_v5 = vld [vmem:[%s3795_s28 + $0x440] sm:$0xff]   ;;  %v3636_v6 = vld [vmem:[%s3795_s28 + $0x488] sm:$0xff]   ;;  %v3686_v0 = vld [vmem:[%s3795_s28 + $0x658] sm:$0xff]  }
  0x7a   : > { %3282 = vmatprep.subr.bf16.mxu1 %v3581_v7 }
  0x7b   : > { %3261 = vmatpush3.bf16.msra.mxu0 %v3582_v8  ;;  %v815_v7 = vrot.slane %v793_v3, %v3833_v42  ;;  %v794_v8 = vcombine.high %v3982_v4, %v3982_v4 }
  0x7c   : > { %3262 = vmatprep.subr.bf16.mxu0 %v3584_v9  ;;  %v3638_v9 = vld [vmem:[%s3795_s28 + $0x4c0] sm:$0xff]  }
  0x7d   : > { %3283 = vmatpush3.bf16.msra.mxu1 %v3583_v10  ;;  %v3639_v10 = vld [vmem:[%s3795_s28 + $0x400] sm:$0xff]  }
  0x7e   : > { %3284 = vmatprep.subr.bf16.mxu1 %v3585_v11  ;;  %v825_v11 = vcombine.high %v815_v7, %v815_v7 }
  0x7f   : > { %3263 = vmatpush3.bf16.msra.mxu0 %v3586_v12  ;;  %v801_v12 = vrot.slane %v785_v63, %v3833_v42  ;;  %v3684_v63 = vld [vmem:[%s3795_s28 + $0x620] sm:$0xff]  }
  0x80   : > { %3264 = vmatprep.subr.bf16.mxu0 %v3588_v13  ;;  %v3641_v13 = vld [vmem:[%s3795_s28 + $0x578] sm:$0xff]  }
  0x81   : > { %3285 = vmatpush3.bf16.msra.mxu1 %v3587_v14  ;;  %v3640_v14 = vld [vmem:[%s3795_s28 + $0x480] sm:$0xff]  }
  0x82   : > { %3286 = vmatprep.subr.bf16.mxu1 %v3589_v15  ;;  %v822_v15 = vrot.slane %v794_v8, %v3833_v42  ;;  %v3690_v8 = vld [vmem:[%s3795_s28 + $0x610] sm:$0xff]  }
  0x83   : > { %3265 = vmatpush3.bf16.msra.mxu0 %v3590_v16  ;;  %v3642_v16 = vld [vmem:[%s3795_s28 + $0x5f8] sm:$0xff]  }
  0x84   : > { %3266 = vmatprep.subr.bf16.mxu0 %v3592_v17  ;;  %v3643_v17 = vld [vmem:[%s3795_s28 + $0x538] sm:$0xff]  }
  0x85   : > { %3287 = vmatpush3.bf16.msra.mxu1 %v3591_v18  ;;  %v823_v18 = vcombine.high %v801_v12, %v801_v12 }
  0x86   : > { %3288 = vmatprep.subr.bf16.mxu1 %v3593_v19  ;;  %v3645_v19 = vld [vmem:[%s3795_s28 + $0x570] sm:$0xff]  }
  0x87   : > { %3267 = vmatpush3.bf16.msra.mxu0 %v3594_v20  ;;  %v3644_v20 = vld [vmem:[%s3795_s28 + $0x5b8] sm:$0xff]  }
  0x88   : > { %3268 = vmatprep.subr.bf16.mxu0 %v3596_v21  ;;  %v826_v21 = vcombine.high %v822_v15, %v822_v15 }
  0x89   : > { %3289 = vmatpush3.bf16.msra.mxu1 %v3595_v22  ;;  %v3646_v22 = vld [vmem:[%s3795_s28 + $0x5f0] sm:$0xff]  }
  0x8a   : > { %3290 = vmatprep.subr.bf16.mxu1 %v3597_v23  ;;  %v3647_v23 = vld [vmem:[%s3795_s28 + $0x530] sm:$0xff]  }
  0x8b   : > { %3269 = vmatpush3.bf16.msra.mxu0 %v3598_v24  ;;  %v3649_v24 = vld [vmem:[%s3795_s28 + $0x568] sm:$0xff]  }
  0x8c   : > { %3270 = vmatprep.subr.bf16.mxu0 %v3600_v25  ;;  %v3648_v25 = vld [vmem:[%s3795_s28 + $0x5b0] sm:$0xff]  }
  0x8d   : > { %3291 = vmatpush3.bf16.msra.mxu1 %v3599_v26  ;;  %v3650_v26 = vld [vmem:[%s3795_s28 + $0x5e8] sm:$0xff]  }
  0x8e   : > { %3292 = vmatprep.subr.bf16.mxu1 %v3601_v27  ;;  %v3651_v27 = vld [vmem:[%s3795_s28 + $0x528] sm:$0xff]  }
  0x8f   : > { %3271 = vmatpush3.bf16.msra.mxu0 %v3602_v28  ;;  %v3653_v28 = vld [vmem:[%s3795_s28 + $0x560] sm:$0xff]  }
  0x90   : > { %3272 = vmatprep.subr.bf16.mxu0 %v3604_v29  ;;  %v3652_v29 = vld [vmem:[%s3795_s28 + $0x5a8] sm:$0xff]  }
  0x91   : > { %3293 = vmatpush3.bf16.msra.mxu1 %v3603_v30  ;;  %v3654_v30 = vld [vmem:[%s3795_s28 + $0x5e0] sm:$0xff]  }
  0x92   : > { %3294 = vmatprep.subr.bf16.mxu1 %v3605_v31  ;;  %v3655_v31 = vld [vmem:[%s3795_s28 + $0x520] sm:$0xff]  }
  0x93   : > { %3273 = vmatpush3.bf16.msra.mxu0 %v3606_v32  ;;  %v3657_v32 = vld [vmem:[%s3795_s28 + $0x558] sm:$0xff]  }
  0x94   : > { %3302 = vmatprep.subr.bf16.mxu0 %v3609_v34  ;;  %v3658_v34 = vld [vmem:[%s3795_s28 + $0x5d8] sm:$0xff]  }
  0x95   : > { %3295 = vmatpush3.bf16.msra.mxu1 %v3607_v35  ;;  %v3659_v35 = vld [vmem:[%s3795_s28 + $0x518] sm:$0xff]  }
  0x96   : > { %2446 = vmatmul.mubr.bf16.vlgmr.msra.gmra.mxu0 %v759_v33  ;;  %3324 = vmatprep.subr.bf16.mxu1 %v3610_v36  ;;  %v3656_v33 = vld [vmem:[%s3795_s28 + $0x5a0] sm:$0xff]   ;;  %v3661_v36 = vld [vmem:[%s3795_s28 + $0x550] sm:$0xff]  }
  0x97   : > { %3303 = vmatpush3.bf16.msra.mxu0 %v3611_v37  ;;  %2525 = vmatprep.mubr.bf16.mxu0 %v815_v7  ;;  %v3660_v37 = vld [vmem:[%s3795_s28 + $0x598] sm:$0xff]  }
  0x98   : > { %2486 = vmatmul.mubr.bf16.vlgmr.msra.gmra.mxu1 %v775_v38  ;;  %3304 = vmatprep.subr.bf16.mxu0 %v3613_v39  ;;  %v3662_v38 = vld [vmem:[%s3795_s28 + $0x5d0] sm:$0xff]   ;;  %v3688_v7 = vld [vmem:[%s3795_s28 + $0x698] sm:$0xff]  }
  0x99   : > { %3325 = vmatpush3.bf16.msra.mxu1 %v3612_v40  ;;  %2565 = vmatprep.mubr.bf16.mxu1 %v825_v11  ;;  %v3663_v39 = vld [vmem:[%s3795_s28 + $0x510] sm:$0xff]   ;;  %v3665_v40 = vld [vmem:[%s3795_s28 + $0x548] sm:$0xff]  }
  0x9a   : > { %3326 = vmatprep.subr.bf16.mxu1 %v3614_v41  ;;  %v3664_v41 = vld [vmem:[%s3795_s28 + $0x590] sm:$0xff]   ;;  %v3693_v11 = vld [vmem:[%s3795_s28 + $0x608] sm:$0xff]  }
  0x9b   : > { %3305 = vmatpush3.bf16.msra.mxu0 %v3615_v43  ;;  %v3666_v43 = vld [vmem:[%s3795_s28 + $0x5c8] sm:$0xff]  }
  0x9c   : > { %3306 = vmatprep.subr.bf16.mxu0 %v3617_v44  ;;  %v3667_v44 = vld [vmem:[%s3795_s28 + $0x508] sm:$0xff]  }
  0x9d   : > { %3327 = vmatpush3.bf16.msra.mxu1 %v3616_v45  ;;  %v3669_v45 = vld [vmem:[%s3795_s28 + $0x540] sm:$0xff]  }
  0x9e   : > { %3328 = vmatprep.subr.bf16.mxu1 %v3618_v46  ;;  %v3668_v46 = vld [vmem:[%s3795_s28 + $0x588] sm:$0xff]  }
  0x9f   : > { %3307 = vmatpush3.bf16.msra.mxu0 %v3619_v47  ;;  %v3670_v47 = vld [vmem:[%s3795_s28 + $0x5c0] sm:$0xff]  }
  0xa0   : > { %3308 = vmatprep.subr.bf16.mxu0 %v3621_v48  ;;  %v3671_v48 = vld [vmem:[%s3795_s28 + $0x500] sm:$0xff]  }
  0xa1   : > { %3329 = vmatpush3.bf16.msra.mxu1 %v3620_v49  ;;  %v808_v49 = vrot.slane %v3982_v4, %v3833_v42  ;;  %v3687_v4 = vld [vmem:[%s3795_s28 + $0x618] sm:$0xff]  }
  0xa2   : > { %3330 = vmatprep.subr.bf16.mxu1 %v3622_v50  ;;  %v3674_v50 = vld [vmem:[%s3795_s28 + $0x678] sm:$0xff]  }
  0xa3   : > { %3309 = vmatpush3.bf16.msra.mxu0 %v3623_v51  ;;  %v3672_v51 = vld [vmem:[%s3795_s28 + $0x580] sm:$0xff]  }
  0xa4   : > { %3310 = vmatprep.subr.bf16.mxu0 %v3625_v52  ;;  %v3675_v52 = vld [vmem:[%s3795_s28 + $0x638] sm:$0xff]  }
  0xa5   : > { %3331 = vmatpush3.bf16.msra.mxu1 %v3624_v53  ;;  %v824_v53 = vcombine.high %v808_v49, %v808_v49 }
  0xa6   : > { %3332 = vmatprep.subr.bf16.mxu1 %v3626_v54  ;;  %v3677_v54 = vld [vmem:[%s3795_s28 + $0x670] sm:$0xff]  }
  0xa7   : > { %3311 = vmatpush3.bf16.msra.mxu0 %v3627_v55  ;;  %v3676_v55 = vld [vmem:[%s3795_s28 + $0x6b8] sm:$0xff]  }
  0xa8   : > { %3312 = vmatprep.subr.bf16.mxu0 %v3629_v56  ;;  %v3740_v56 = vmov 0.0  }
  0xa9   : > { %3333 = vmatpush3.bf16.msra.mxu1 %v3628_v57  ;;  %v3678_v57 = vld [vmem:[%s3795_s28 + $0x630] sm:$0xff]  }
  0xaa   : > { %3334 = vmatprep.subr.bf16.mxu1 %v3630_v58  ;;  %v3680_v58 = vld [vmem:[%s3795_s28 + $0x668] sm:$0xff]  }
  0xab   : > { %3313 = vmatpush3.bf16.msra.mxu0 %v3631_v59  ;;  %v3679_v59 = vld [vmem:[%s3795_s28 + $0x6b0] sm:$0xff]  }
  0xac   : > { %3314 = vmatprep.subr.bf16.mxu0 %v3633_v60  ;;  %v3681_v60 = vld [vmem:[%s3795_s28 + $0x628] sm:$0xff]  }
  0xad   : > { %3335 = vmatpush3.bf16.msra.mxu1 %v3632_v62  ;;  %v3682_v62 = vld [vmem:[%s3795_s28 + $0x6a8] sm:$0xff]  }
  0xae   : > { %3336 = vmatprep.subr.bf16.mxu1 %v3634_v1  ;;  %v3685_v1 = vld [vmem:[%s3795_s28 + $0x6a0] sm:$0xff]  }
  0xaf   : > { %3315 = vmatpush3.bf16.msra.mxu0 %v3635_v2  ;;  %v2897_v2 = vld.sshfl [vmem:[%s3790_s24 + $0x18] sm:$0x13 pattern:$0x75316420] }
  0xb0   : > { %3316 = vmatprep.subr.bf16.mxu0 %v3637_v5  ;;  %v834_v3 = vcombine.high %v2897_v2, %v2897_v2  ;;  %v3689_v5 = vld [vmem:[%s3795_s28 + $0x650] sm:$0xff]  }
  0xb1   : > { %3337 = vmatpush3.bf16.msra.mxu1 %v3636_v6 }
  0xb2   : > { %3338 = vmatprep.subr.bf16.mxu1 %v3638_v9  ;;  %v848_v6 = vrot.slane %v834_v3, %v3833_v42  ;;  %v3692_v9 = vld [vmem:[%s3795_s28 + $0x648] sm:$0xff]  }
  0xb3   : > { %3317 = vmatpush3.bf16.msra.mxu0 %v3639_v10  ;;  %v3691_v10 = vld [vmem:[%s3795_s28 + $0x690] sm:$0xff]  }
  0xb4   : > { %3346 = vmatprep.subr.bf16.mxu0 %v3641_v13  ;;  %v3694_v13 = vld [vmem:[%s3795_s28 + $0x688] sm:$0xff]  }
  0xb5   : > { %3339 = vmatpush3.bf16.msra.mxu1 %v3640_v14  ;;  %v3696_v14 = vld [vmem:[%s3795_s28 + $0x600] sm:$0xff]  }
  0xb6   : > { %2526 = vmatmul.mubr.bf16.vlgmr.msra.gmra.mxu0 %v801_v12  ;;  %3368 = vmatprep.subr.bf16.mxu1 %v3642_v16  ;;  %v3695_v12 = vld [vmem:[%s3795_s28 + $0x640] sm:$0xff]  }
  0xb7   : > { %3347 = vmatpush3.bf16.msra.mxu0 %v3643_v17  ;;  %2605 = vmatprep.mubr.bf16.mxu0 %v822_v15  ;;  %v841_v15 = vrot.slane %v2897_v2, %v3833_v42  ;;  %v3697_v16 = vld [vmem:[%s3795_s28 + $0x680] sm:$0xff]  }
  0xb8   : > { %2566 = vmatmul.mubr.bf16.vlgmr.msra.gmra.mxu1 %v823_v18  ;;  %3348 = vmatprep.subr.bf16.mxu0 %v3645_v19 }
  0xb9   : > { %3369 = vmatpush3.bf16.msra.mxu1 %v3644_v20  ;;  %2645 = vmatprep.mubr.bf16.mxu1 %v826_v21  ;;  %v849_v17 = vcombine.high %v841_v15, %v841_v15 }
  0xba   : > { %3370 = vmatprep.subr.bf16.mxu1 %v3646_v22 }
  0xbb   : > { %3349 = vmatpush3.bf16.msra.mxu0 %v3647_v23 }
  0xbc   : > { %3350 = vmatprep.subr.bf16.mxu0 %v3649_v24 }
  0xbd   : > { %3371 = vmatpush3.bf16.msra.mxu1 %v3648_v25 }
  0xbe   : > { %3372 = vmatprep.subr.bf16.mxu1 %v3650_v26 }
  0xbf   : > { %3351 = vmatpush3.bf16.msra.mxu0 %v3651_v27 }
  0xc0   : > { %3352 = vmatprep.subr.bf16.mxu0 %v3653_v28 }
  0xc1   : > { %3373 = vmatpush3.bf16.msra.mxu1 %v3652_v29 }
  0xc2   : > { %3374 = vmatprep.subr.bf16.mxu1 %v3654_v30 }
  0xc3   : > { %3353 = vmatpush3.bf16.msra.mxu0 %v3655_v31 }
  0xc4   : > { %3354 = vmatprep.subr.bf16.mxu0 %v3657_v32 }
  0xc5   : > { %3375 = vmatpush3.bf16.msra.mxu1 %v3656_v33 }
  0xc6   : > { %3376 = vmatprep.subr.bf16.mxu1 %v3658_v34 }
  0xc7   : > { %3355 = vmatpush3.bf16.msra.mxu0 %v3659_v35 }
  0xc8   : > { %3356 = vmatprep.subr.bf16.mxu0 %v3661_v36 }
  0xc9   : > { %3377 = vmatpush3.bf16.msra.mxu1 %v3660_v37 }
  0xca   : > { %3378 = vmatprep.subr.bf16.mxu1 %v3662_v38 }
  0xcb   : > { %3357 = vmatpush3.bf16.msra.mxu0 %v3663_v39 }
  0xcc   : > { %3358 = vmatprep.subr.bf16.mxu0 %v3665_v40 }
  0xcd   : > { %3379 = vmatpush3.bf16.msra.mxu1 %v3664_v41 }
  0xce   : > { %3380 = vmatprep.subr.bf16.mxu1 %v3666_v43 }
  0xcf   : > { %3359 = vmatpush3.bf16.msra.mxu0 %v3667_v44 }
  0xd0   : > { %3360 = vmatprep.subr.bf16.mxu0 %v3669_v45 }
  0xd1   : > { %3381 = vmatpush3.bf16.msra.mxu1 %v3668_v46 }
  0xd2   : > { %3382 = vmatprep.subr.bf16.mxu1 %v3670_v47 }
  0xd3   : > { %3361 = vmatpush3.bf16.msra.mxu0 %v3671_v48 }
  0xd4   : > { %3390 = vmatprep.subr.bf16.mxu0 %v3674_v50 }
  0xd5   : > { %3383 = vmatpush3.bf16.msra.mxu1 %v3672_v51 }
  0xd6   : > { %2606 = vmatmul.mubr.bf16.vlgmr.msra.gmra.mxu0 %v808_v49  ;;  %3426 = vmatprep.subr.bf16.mxu1 %v3740_v56 }
  0xd7   : > { %3391 = vmatpush3.bf16.msra.mxu0 %v3675_v52  ;;  %2685 = vmatprep.mubr.bf16.mxu0 %v848_v6 }
  0xd8   : > { %2646 = vmatmul.mubr.bf16.vlgmr.msra.gmra.mxu1 %v824_v53  ;;  %3392 = vmatprep.subr.bf16.mxu0 %v3677_v54 }
  0xd9   : > { %3427 = vmatpush3.bf16.msra.mxu1 %v3676_v55  ;;  %3442 = vmatprep.mubr.msk.bf16.mxu1 %vm3741_vm1, %v3740_v56 }
  0xda   : > { %3428 = vmatprep.subr.bf16.mxu1 %v3740_v56 }
  0xdb   : > { %3393 = vmatpush3.bf16.msra.mxu0 %v3678_v57 }
  0xdc   : > { %3394 = vmatprep.subr.bf16.mxu0 %v3680_v58 }
  0xdd   : > { %3429 = vmatpush3.bf16.msra.mxu1 %v3679_v59 }
  0xde   : > { %3430 = vmatprep.subr.bf16.mxu1 %v3740_v56 }
  0xdf   : > { %3395 = vmatpush3.bf16.msra.mxu0 %v3681_v60 }
  0xe0   : > { %3396 = vmatprep.subr.bf16.mxu0 %v3683_v61 }
  0xe1   : > { %3431 = vmatpush3.bf16.msra.mxu1 %v3682_v62 }
  0xe2   : > { %3432 = vmatprep.subr.bf16.mxu1 %v3740_v56 }
  0xe3   : > { %3397 = vmatpush3.bf16.msra.mxu0 %v3684_v63 }
  0xe4   : > { %3398 = vmatprep.subr.bf16.mxu0 %v3686_v0 }
  0xe5   : > { %3433 = vmatpush3.bf16.msra.mxu1 %v3685_v1 }
  0xe6   : > { %3434 = vmatprep.subr.bf16.mxu1 %v3740_v56 }
  0xe7   : > { %3399 = vmatpush3.bf16.msra.mxu0 %v3687_v4 }
  0xe8   : > { %3400 = vmatprep.subr.bf16.mxu0 %v3689_v5 }
  0xe9   : > { %3435 = vmatpush3.bf16.msra.mxu1 %v3688_v7 }
  0xea   : > { %3436 = vmatprep.subr.bf16.mxu1 %v3740_v56 }
  0xeb   : > { %3401 = vmatpush3.bf16.msra.mxu0 %v3690_v8 }
  0xec   : > { %3402 = vmatprep.subr.bf16.mxu0 %v3692_v9 }
  0xed   : > { %3437 = vmatpush3.bf16.msra.mxu1 %v3691_v10 }
  0xee   : > { %3438 = vmatprep.subr.bf16.mxu1 %v3740_v56 }
  0xef   : > { %3403 = vmatpush3.bf16.msra.mxu0 %v3693_v11 }
  0xf0   : > { %3404 = vmatprep.subr.bf16.mxu0 %v3695_v12 }
  0xf1   : > { %3439 = vmatpush3.bf16.msra.mxu1 %v3694_v13 }
  0xf2   : > { %3440 = vmatprep.subr.bf16.mxu1 %v3740_v56 }
  0xf3   : > { %3405 = vmatpush3.bf16.msra.mxu0 %v3696_v14 }
  0xf5   : > { %3441 = vmatpush3.bf16.msra.mxu1 %v3697_v16 }
  0xf6   : > { %v3142_v18 = vpop.f32.mrf.mxu0  ;;  %2686 = vmatmul.mubr.bf16.vlgmr.msra.gmra.mxu0 %v841_v15 }
  0xf7   : > { %v3164_v19 = vpop.f32.mrf.mxu1 }
  0xf8   : > { %3443 = vmatmul.mubr.bf16.vlgmr.msra.gmra.mxu1 %v849_v17  ;;  %v3143_v20 = vpop.f32.mrf.mxu0 }
  0xf9   : > { %v3144_v21 = vadd.f32 %v3143_v20, %v3142_v18  ;;  %v3165_v22 = vpop.f32.mrf.mxu1 }
  0xfa   : > { %v3145_v23 = vpop.f32.mrf.mxu0  ;;  %v3166_v24 = vadd.f32 %v3165_v22, %v3164_v19 }
  0xfb   : > { %v3167_v25 = vpop.f32.mrf.mxu1 }
  0xfc   : > { %v3146_v26 = vpop.f32.mrf.mxu0  ;;  %v2248_v27 = vadd.f32 %v3166_v24, %v3144_v21 }
  0xfd   : > { %v3168_v28 = vpop.f32.mrf.mxu1 }
 0x116   : > { %v3186_v42 = vpop.f32.mrf.mxu0 }
 0x117   : > { %v3208_v29 = vpop.f32.mrf.mxu1 }
 0x118   : > { %v3187_v30 = vpop.f32.mrf.mxu0 }
 0x119   : > { %v3188_v31 = vadd.f32 %v3187_v30, %v3186_v42  ;;  %v3209_v32 = vpop.f32.mrf.mxu1 }
 0x11a   : > { %v3189_v33 = vpop.f32.mrf.mxu0  ;;  %v3210_v35 = vadd.f32 %v3209_v32, %v3208_v29 }
 0x11b   : > { %v2288_v34 = vadd.f32 %v3188_v31, %v2248_v27  ;;  %v3211_v36 = vpop.f32.mrf.mxu1  ;;  %v239_v31 = vld [vmem:[#allocation2] sm:$0x3] }
 0x11c   : > { %v3190_v37 = vpop.f32.mrf.mxu0 }
 0x11d   : > { %v2328_v38 = vadd.f32 %v3210_v35, %v2288_v34  ;;  %v3212_v39 = vpop.f32.mrf.mxu1 }
 0x136   : > { %v3230_v40 = vpop.f32.mrf.mxu0 }
 0x138   : > { %v3252_v41 = vpop.f32.mrf.mxu1  ;;  %v3231_v43 = vpop.f32.mrf.mxu0 }
 0x139   : > { %v3232_v44 = vadd.f32 %v3231_v43, %v3230_v40 }
 0x13a   : > { %v3253_v45 = vpop.f32.mrf.mxu1  ;;  %v3233_v46 = vpop.f32.mrf.mxu0 }
 0x13b   : > { %v2368_v47 = vadd.f32 %v3232_v44, %v2328_v38  ;;  %v3254_v48 = vadd.f32 %v3253_v45, %v3252_v41 }
 0x13c   : > { %v3255_v49 = vpop.f32.mrf.mxu1  ;;  %v3234_v50 = vpop.f32.mrf.mxu0 }
 0x13d   : > { %v2408_v51 = vadd.f32 %v3254_v48, %v2368_v47 }
 0x13e   : > { %v3256_v52 = vpop.f32.mrf.mxu1 }
 0x156   : > { %v3274_v53 = vpop.f32.mrf.mxu0 }
 0x158   : > { %v3296_v54 = vpop.f32.mrf.mxu1  ;;  %v3275_v55 = vpop.f32.mrf.mxu0 }
 0x159   : > { %v3276_v56 = vadd.f32 %v3275_v55, %v3274_v53 }
 0x15a   : > { %v3297_v57 = vpop.f32.mrf.mxu1  ;;  %v3277_v58 = vpop.f32.mrf.mxu0 }
 0x15b   : > { %v2448_v59 = vadd.f32 %v3276_v56, %v2408_v51  ;;  %v3298_v60 = vadd.f32 %v3297_v57, %v3296_v54 }
 0x15c   : > { %v3299_v61 = vpop.f32.mrf.mxu1  ;;  %v3278_v62 = vpop.f32.mrf.mxu0 }
 0x15d   : > { %v2488_v63 = vadd.f32 %v3298_v60, %v2448_v59 }
 0x15e   : > { %v3300_v0 = vpop.f32.mrf.mxu1 }
 0x176   : > { %v3318_v1 = vpop.f32.mrf.mxu0 }
 0x178   : > { %v3340_v2 = vpop.f32.mrf.mxu1  ;;  %v3319_v3 = vpop.f32.mrf.mxu0 }
 0x179   : > { %v3320_v17 = vadd.f32 %v3319_v3, %v3318_v1 }
 0x17a   : > { %v3341_v4 = vpop.f32.mrf.mxu1  ;;  %v3321_v5 = vpop.f32.mrf.mxu0 }
 0x17b   : > { %v2528_v18 = vadd.f32 %v3320_v17, %v2488_v63  ;;  %v3342_v19 = vadd.f32 %v3341_v4, %v3340_v2 }
 0x17c   : > { %v3343_v6 = vpop.f32.mrf.mxu1  ;;  %v3322_v7 = vpop.f32.mrf.mxu0 }
 0x17d   : > { %v2568_v21 = vadd.f32 %v3342_v19, %v2528_v18 }
 0x17e   : > { %v3344_v8 = vpop.f32.mrf.mxu1 }
 0x196   : > { %v3362_v9 = vpop.f32.mrf.mxu0 }
 0x198   : > { %v3384_v10 = vpop.f32.mrf.mxu1  ;;  %v3363_v11 = vpop.f32.mrf.mxu0 }
 0x199   : > { %v3364_v20 = vadd.f32 %v3363_v11, %v3362_v9 }
 0x19a   : > { %v3385_v12 = vpop.f32.mrf.mxu1  ;;  %v3365_v13 = vpop.f32.mrf.mxu0 }
 0x19b   : > { %v2608_v22 = vadd.f32 %v3364_v20, %v2568_v21  ;;  %v3386_v23 = vadd.f32 %v3385_v12, %v3384_v10 }
 0x19c   : > { %v3387_v14 = vpop.f32.mrf.mxu1  ;;  %v3366_v15 = vpop.f32.mrf.mxu0 }
 0x19d   : > { %v2648_v27 = vadd.f32 %v3386_v23, %v2608_v22 }
 0x19e   : > { %v3388_v16 = vpop.f32.mrf.mxu1 }
 0x1b6   : > { %v3406_v24 = vpop.f32.mrf.mxu0 }
 0x1b8   : > { %v2727_v25 = vpop.f32.mrf.mxu1  ;;  %v3407_v26 = vpop.f32.mrf.mxu0 }
 0x1b9   : > { %v3408_v28 = vadd.f32 %v3407_v26, %v3406_v24 }
 0x1ba   : > { %v3444_v42 = vpop.f32.mrf.mxu1  ;;  %v3409_v29 = vpop.f32.mrf.mxu0 }
 0x1bb   : > { %v2688_v30 = vadd.f32 %v3408_v28, %v2648_v27 }
 0x1bc   : > { %v2730_v32 = vpop.f32.mrf.mxu1  ;;  %v3410_v33 = vpop.f32.mrf.mxu0 }
 0x1bd   : > { %v2728_v34 = vadd.f32 %v2727_v25, %v2688_v30  ;;  %2739 = sbr.rel (%p3114_p6) target bundleno = 666 (0x29a), region = 48 }
 0x1be   : > { %v3445_v35 = vpop.f32.mrf.mxu1 }
 0x1bf   : > { %v2733_v36 = vadd.f32 %v2728_v34, %v239_v31 }
 0x1c1   : > { %2735 = vst.msk [vmem:[#allocation2] sm:$0x3] %vm2734_vm2, %v2733_v36 }
 0x1c2   : > { %v3698_v37 = vld [vmem:[%s4092_s3 + $0x18] sm:$0xff]   ;;  %v3742_v38 = vmov 0.0   ;;  %v3699_v39 = vld [vmem:[%s4092_s3 + $0x10] sm:$0xff]   ;;  %vm3743_vm3 = vmmov 0   ;;  %v3115_v41 = vld [vmem:[%s4091_s2] ss:$0 sm:$0xff] }
 0x1c3   : > { %3446 = vmatprep.subr.bf16.mxu0 %v3742_v38  ;;  %3454 = vmatprep.mubr.msk.bf16.mxu0 %vm3743_vm3, %v3742_v38  ;;  %v3700_v44 = vld [vmem:[%s4092_s3 + $0x8] sm:$0xff]   ;;  %v3701_v46 = vld [vmem:[%s4092_s3] sm:$0xff]   ;;  %vm2790_vm4 = vcmask 523264   ;;  %vm2834_vm5 = vcmask 41984  }
 0x1c4   : > { %3447 = vmatpush3.bf16.msra.mxu0 %v3698_v37  ;;  %v3116_v48 = vld [vmem:[%s4093_s4] ss:$0 sm:$0xff] }
 0x1c5   : > { %3448 = vmatprep.subr.bf16.mxu0 %v3742_v38 }
 0x1c8   : > { %v2740_v40 = vld [vmem:[#allocation2] sm:$0x3]  ;;  %3449 = vmatpush3.bf16.msra.mxu0 %v3699_v39 }
 0x1c9   : > { %v2748_v43 = vadd.f32 %v3115_v41, %v2740_v40  ;;  %3450 = vmatprep.subr.bf16.mxu0 %v3742_v38 }
 0x1cb   : > { %v2749_v45 = vmax.f32 %v2748_v43, 0.0 }
 0x1cc   : > { %3451 = vmatpush3.bf16.msra.mxu0 %v3700_v44 }
 0x1cd   : > { %3452 = vmatprep.subr.bf16.mxu0 %v3742_v38  ;;  %v2750_v47 = vpack.c.bf16 %v2749_v45, %v2749_v45 }
 0x1d0   : > { %3453 = vmatpush3.bf16.msra.mxu0 %v3701_v46 }
 0x1d3   : > { %3455 = vmatmul.mubr.msk.bf16.vlgmr.msra.gmra.mxu0 %vm2790_vm4, %v2750_v47 }
 0x293   : > { %v2828_v49 = vpop.f32.mrf.mxu0 }
 0x294   : > { %v2829_v50 = vadd.f32 %v3116_v48, %v2828_v49 }
 0x295   : > { %v3456_v51 = vpop.f32.mrf.mxu0 }
 0x296   : > { %2835 = vst.msk [vmem:[#allocation3] sm:$0x3] %vm2834_vm5, %v2829_v50 }
 0x297   : > { %v2831_v52 = vpop.f32.mrf.mxu0 }
 0x299   : > { %v3457_v53 = vpop.f32.mrf.mxu0 }
 0x29a PF: > { %p3462_p7 = scmp.eq.s32.totalorder %s3781_s19, 2  ;;  %s3744_s16 = smov [#allocation3]  }
 0x29b   : > { %s2843_s17 = sshll.u32 %s3744_s16, 4  ;;  %s2844_s17 = int_to_ptr.vmem [resolvable:$true] %s2843_s17 }
 0x29c   : > { %s3702_s20 = scalar_lea.vmem %s2844_s17, 32  ;;  %p3709_p11 = scmp.lt.s32.totalorder %s2844_s17, %s2844_s17 }
 0x29d   : > { %p3703_p8 = scmp.ne.s32.totalorder %s2844_s17, %s3702_s20  ;;  %p3710_p12 = scmp.lt.s32.totalorder %s3702_s20, %s3702_s20 }
 0x29f   : > { %p3704_p9 = pnand %p3703_p8, %p3462_p7  ;;  %p3711_p13 = por %p3710_p12, %p3709_p11 }
 0x2a1   : > { %p3705_p10 = pneg %p3704_p9 }
 0x2a3   : > { %p3712_p0 = pnand %p3711_p13, %p3705_p10 }
 0x2a5   : > { %3715 = shalt.err (!%p3712_p0)
}
 0x2a6   : > { %3459 = dma.vmem_to_hbm [thread:$0]  (%p3462_p7), %s2844_s17, 32, %s4094_s5, [#allocation4]  }
 0x2a7   : > { %3731 = dma.done.wait (%p3462_p7), [#allocation4], 32  }
 0x2a8   : > { %3733 = vsyncadd (%p3462_p7), [#allocation4], 4294967264 }
 0x2a9 PF: > { %s16_s18 = sadd.s32 1, %s3736_s18  }
 0x2aa   : > { %p13_p1 = scmp.ge.s32.totalorder %s16_s18, 5  }
 0x2ac   :  { %15 = sbr.rel (!%p13_p1) target bundleno = 1 (0x1), region = 78 }
 0x2b1   :  { %2856 = vsyncpa [#allocation4], 1 }
 0x2b2   :  { %2858 = vsyncpa [#allocation4 + $0x1], 1 }

</bundles_post_ra>
